<compile_context>
chip_gen: v6e
topology: v6e:2x2x1
jax: 0.10.0
libtpu: 0.0.40
codegen_flags: <defaults>
</compile_context>

<pallas_src>
import math

import jax
import jax.numpy as jnp
from jax import lax
from jax.experimental import pallas as pl
from jax.experimental.pallas import tpu as pltpu


def _round_up(x, m):
    return ((x + m - 1) // m) * m


def _cdiv(a, b):
    return (a + b - 1) // b


def _vmem_capacity_bytes():
    """Per-core VMEM capacity; conservative (v7x) default if the query is unavailable."""
    try:
        info = pltpu.get_tpu_info()
        cap = getattr(info, "vmem_capacity_bytes", None)
        if cap:
            return int(cap)
    except Exception:
        pass
    return 64 * 1024 * 1024


# ----------------------------------------------------------------------------
# Plain-JAX glue: furthest point sampling, ball query, grouping (gathers).
# ----------------------------------------------------------------------------
def furthest_point_sampling(coords_bn3, num_centers):
    """coords_bn3: (B, N, 3) float32 -> (idxs (B,M) int32, centers (B,M,3))."""
    # TODO(synk): at production N/M this sequential argmax loop should become a Pallas
    # kernel that keeps the (B, N) running-distance array resident in VMEM.
    B, N, _ = coords_bn3.shape

    def body(i, state):
        idxs, dists, last = state
        last_pt = jnp.take_along_axis(coords_bn3, last[:, None, None], axis=1)  # (B,1,3)
        d = jnp.sum((coords_bn3 - last_pt) ** 2, axis=-1)                       # (B,N)
        dists = jnp.minimum(dists, d)
        nxt = jnp.argmax(dists, axis=-1).astype(jnp.int32)
        idxs = idxs.at[:, i].set(nxt)
        return idxs, dists, nxt

    idxs0 = jnp.zeros((B, num_centers), jnp.int32)          # first center = index 0
    dists0 = jnp.full((B, N), 1e10, jnp.float32)
    last0 = jnp.zeros((B,), jnp.int32)
    idxs, _, _ = lax.fori_loop(1, num_centers, body, (idxs0, dists0, last0))
    centers = jnp.take_along_axis(coords_bn3, idxs[..., None], axis=1)
    return idxs, centers


def ball_query(coords_bn3, centers_bm3, radius, num_neighbors):
    """(B,M,K) int32 neighbor indices, matching the CUDA ball_query semantics:
    the first K points (in index order) with dist^2 < radius^2; if fewer than K are
    found, remaining slots repeat the first valid neighbor (index 0 if none at all)."""
    N = coords_bn3.shape[1]
    d2 = jnp.sum(
        (centers_bm3[:, :, None, :] - coords_bn3[:, None, :, :]) ** 2, axis=-1
    )  # (B, M, N)
    valid = d2 < (radius * radius)
    iota = jnp.arange(N, dtype=jnp.int32)
    keys = jnp.where(valid, iota[None, None, :], N)          # invalid -> sentinel N
    neg_topk, _ = lax.top_k(-keys, num_neighbors)             # K smallest keys
    cand = (-neg_topk).astype(jnp.int32)                      # (B, M, K), ascending index
    has = cand < N
    first = jnp.where(has[..., :1], cand[..., :1], 0)         # no neighbor at all -> 0
    return jnp.where(has, cand, first)


def group_neighbors(coords_bn3, feats_bnc, centers_bm3, nbr_idx, include_coordinates):
    """Gather neighbor (relative coords ++ features) -> (B, M, K, 3 + C_in)."""
    B, M, K = nbr_idx.shape
    flat = nbr_idx.reshape(B, M * K)
    g_coords = jnp.take_along_axis(coords_bn3, flat[..., None], axis=1).reshape(B, M, K, 3)
    g_coords = g_coords - centers_bm3[:, :, None, :]
    g_feats = jnp.take_along_axis(feats_bnc, flat[..., None], axis=1).reshape(B, M, K, -1)
    if include_coordinates:
        return jnp.concatenate([g_coords, g_feats], axis=-1)  # coords first (torch.cat dim=1)
    return g_feats


# ----------------------------------------------------------------------------
# Pallas kernel: SharedMLP (1x1 conv + folded BN + ReLU stack) + max over neighbors.
# Channel-on-sublane / centers-on-lane layout.
# ----------------------------------------------------------------------------
def _make_mlp_max_kernel(num_layers, Kc):
    """refs layout: x_ref, (wT, b) * num_layers, out_ref."""

    def kernel(x_ref, *refs):
        o_ref = refs[2 * num_layers]
        kc = pl.program_id(1)

        # Output block index is constant over the neighbor-chunk ("arbitrary") axis,
        # so it stays resident in VMEM and doubles as the running-max accumulator.
        @pl.when(kc == 0)
        def _init():
            o_ref[...] = jnp.full(o_ref.shape, -jnp.inf, o_ref.dtype)

        ws = [refs[2 * l][...] for l in range(num_layers)]        # (C_next, C_prev) bf16
        bs = [refs[2 * l + 1][...] for l in range(num_layers)]    # (C_next, 1)      f32

        m = o_ref[...]                                            # (C_out_pad, Tm)  f32
        for k in range(Kc):                                       # static unroll
            h = x_ref[k]                                          # (Cg, Tm) bf16
            for l in range(num_layers):
                # bf16 MXU, f32 accumulate; bias / ReLU stay in f32 (v5e-safe VPU).
                h = jnp.dot(ws[l], h, preferred_element_type=jnp.float32) + bs[l]
                h = jnp.maximum(h, 0.0)
                if l + 1 < num_layers:
                    h = h.astype(ws[l].dtype)                     # back to bf16 for MXU
            # Single VPU max per neighbor slab; the per-slab matmuls are independent
            # across k, so the short fold chain is hidden behind them.
            m = jnp.maximum(m, h)
        o_ref[...] = m

    return kernel


def shared_mlp_max(grouped, weights, biases, *, max_lane_tile=None,
                   x_block_budget_bytes=2 * 1024 * 1024):
    """grouped: (B, M, K, Cg) f32; weights[l]: (C_l, C_{l+1}); biases[l]: (1, C_{l+1}).
    Returns (B, C_last, M) f32 == max over K of the shared MLP applied per neighbor."""
    B, M, K, Cg = grouped.shape
    C_last = weights[-1].shape[1]
    C_out_pad = _round_up(C_last, 8)               # sublane-aligned output channels
    R = B * M                                      # centers, flattened over batch

    phys_vmem = _vmem_capacity_bytes()
    if max_lane_tile is None:
        # v5e/v6e (128 MiB VMEM) can take larger lane tiles than v7x (64 MiB).
        max_lane_tile = 4096 if phys_vmem >= (100 << 20) else 2048

    # Lane (center) tiling: as large as allowed, but keep >= 2 tiles on the "parallel"
    # grid axis whenever possible so both v7x TensorCores get work.
    G = _cdiv(R, 128)
    g_tile = max(1, min(max_lane_tile // 128, G))
    if G >= 2:
        g_tile = max(1, min(g_tile, _cdiv(G, 2)))
    Tm = g_tile * 128
    Rp = _round_up(R, Tm)
    n_ct = Rp // Tm

    # Neighbor chunking: Kc divides K (no neighbor-padding copy of x).
    Cgp = _round_up(Cg, 8)
    Kc = 1
    for d in range(K, 0, -1):
        if K % d == 0 and d * Cgp * Tm * 2 <= x_block_budget_bytes:
            Kc = d
            break
    n_kc = K // Kc

    # Channel-on-sublane / centers-on-lane layout, streamed in bf16.
    # TODO(synk): fuse this gather/transpose into the kernel via scalar-prefetched
    # indices + manual DMA to remove the HBM materialization of the largest intermediate.
    x = jnp.transpose(grouped.astype(jnp.bfloat16).reshape(R, K, Cg), (1, 2, 0))  # (K,Cg,R)
    if Rp > R:
        x = jnp.pad(x, ((0, 0), (0, 0), (0, Rp - R)))

    # Transposed weights (C_next, C_prev) in bf16; biases (C_next, 1) in f32.
    wT = [jnp.transpose(w).astype(jnp.bfloat16) for w in weights]
    bT = [jnp.transpose(b).astype(jnp.float32) for b in biases]
    wT[-1] = jnp.pad(wT[-1], ((0, C_out_pad - C_last), (0, 0)))   # zero rows -> zero outputs
    bT[-1] = jnp.pad(bT[-1], ((0, C_out_pad - C_last), (0, 0)))

    in_specs = [pl.BlockSpec((Kc, Cg, Tm), lambda ct, kc: (kc, 0, ct))]
    args = [x]
    wb_bytes = 0
    for w, b in zip(wT, bT):
        in_specs.append(pl.BlockSpec(w.shape, lambda ct, kc: (0, 0)))
        in_specs.append(pl.BlockSpec(b.shape, lambda ct, kc: (0, 0)))
        args += [w, b]
        wb_bytes += _round_up(w.shape[0], 8) * _round_up(w.shape[1], 128) * 2
        wb_bytes += _round_up(b.shape[0], 8) * 128 * 4

    # Generation-aware VMEM budget: double-buffered blocks + in-kernel f32 temporaries
    # + slack, capped at 45% of physical VMEM (v7x = 64 MiB, v5e/v6e = 128 MiB).
    x_blk = Kc * Cgp * Tm * 2
    out_blk = C_out_pad * Tm * 4
    widest = max(_round_up(w.shape[0], 8) for w in wT)
    tmp_bytes = 4 * widest * Tm * 4
    est = 2 * x_blk + 2 * out_blk + 2 * wb_bytes + tmp_bytes + (1 << 20)
    vmem_limit = min(max(2 * est, 24 << 20), int(phys_vmem * 0.45))
    vmem_limit = max(vmem_limit, est + (4 << 20))

    out = pl.pallas_call(
        _make_mlp_max_kernel(len(wT), Kc),
        out_shape=jax.ShapeDtypeStruct((C_out_pad, Rp), jnp.float32),
        grid=(n_ct, n_kc),
        in_specs=in_specs,
        out_specs=pl.BlockSpec((C_out_pad, Tm), lambda ct, kc: (0, ct)),
        compiler_params=pltpu.CompilerParams(
            dimension_semantics=("parallel", "arbitrary"),
            vmem_limit_bytes=int(vmem_limit),
        ),
    )(*args)
    # (C_out_pad, Rp) -> (B, C_last, M)
    return out[:C_last, :R].reshape(C_last, B, M).transpose(1, 0, 2)


def _ref_mlp_max(grouped, weights, biases):
    """Pure-JAX f32 reference of the kernel (sanity check). Returns (B, M, C_last)."""
    h = grouped
    for w, b in zip(weights, biases):
        h = jnp.maximum(jnp.einsum("bmkc,cd->bmkd", h, w) + b[0], 0.0)
    return jnp.max(h, axis=2)


# ----------------------------------------------------------------------------
# Module wrapper.
# ----------------------------------------------------------------------------
class PointNetSAModule:
    def __init__(self, num_centers, radius, num_neighbors, in_channels, out_channels,
                 include_coordinates=True, key=None):
        if not isinstance(radius, (list, tuple)):
            radius = [radius]
        if not isinstance(num_neighbors, (list, tuple)):
            num_neighbors = [num_neighbors] * len(radius)
        assert len(radius) == len(num_neighbors)
        if not isinstance(out_channels, (list, tuple)):
            out_channels = [[out_channels]] * len(radius)
        elif not isinstance(out_channels[0], (list, tuple)):
            out_channels = [out_channels] * len(radius)
        assert len(radius) == len(out_channels)

        self.num_centers = num_centers
        self.radius = list(radius)
        self.num_neighbors = list(num_neighbors)
        self.include_coordinates = include_coordinates

        # TODO(synk): BatchNorm2d is applied with eval-mode running stats at init
        # (mean=0, var=1, gamma=1, beta=0) and folded into the 1x1 conv; training-mode
        # batch statistics are not reproduced.
        eps = 1e-5
        bn_scale = 1.0 / math.sqrt(1.0 + eps)

        key = jax.random.PRNGKey(42) if key is None else key
        c0 = in_channels + (3 if include_coordinates else 0)
        self.mlps = []
        for oc_list in out_channels:
            layers, c_in = [], c0
            for oc in oc_list:
                key, kw, kb = jax.random.split(key, 3)
                bound = 1.0 / math.sqrt(c_in)
                # Conv2d(c_in, oc, 1) weight (oc, c_in, 1, 1) stored transposed as (c_in, oc).
                w = jax.random.uniform(kw, (c_in, oc), jnp.float32, -bound, bound) * bn_scale
                b = jax.random.uniform(kb, (1, oc), jnp.float32, -bound, bound) * bn_scale
                layers.append((w, b))
                c_in = oc
            self.mlps.append(layers)

    def __call__(self, features_bcn, coords_b3n):
        coords = jnp.transpose(coords_b3n, (0, 2, 1)).astype(jnp.float32)    # (B, N, 3)
        feats = jnp.transpose(features_bcn, (0, 2, 1)).astype(jnp.float32)   # (B, N, C_in)
        _, centers = furthest_point_sampling(coords, self.num_centers)       # (B, M, 3)

        outs = []
        for r, k, layers in zip(self.radius, self.num_neighbors, self.mlps):
            idx = ball_query(coords, centers, r, k)                          # (B, M, K)
            grouped = group_neighbors(coords, feats, centers, idx,
                                      self.include_coordinates)              # (B, M, K, 3+C)
            weights = [w for (w, _) in layers]
            biases = [b for (_, b) in layers]
            outs.append(shared_mlp_max(grouped, weights, biases))            # (B, C_out, M)
        return jnp.concatenate(outs, axis=1), jnp.transpose(centers, (0, 2, 1))


# ----------------------------------------------------------------------------
# Main.
# ----------------------------------------------------------------------------
if __name__ == "__main__":
    key = jax.random.PRNGKey(0)
    k_coords, k_feats, k_chk = jax.random.split(key, 3)

    B, N, C_in = 2, 64, 4
    coords = jax.random.uniform(k_coords, (B, 3, N), jnp.float32)            # unit cube
    features = jax.random.normal(k_feats, (B, C_in, N), jnp.float32)

    module = PointNetSAModule(
        num_centers=16,
        radius=[0.2, 0.4],
        num_neighbors=[8, 16],
        in_channels=C_in,
        out_channels=[[16, 32], [16, 32]],
        include_coordinates=True,
    )

    fwd = jax.jit(lambda f, c: module(f, c))
    out_features, out_centers = fwd(features, coords)
    out_features = jax.block_until_ready(out_features)
    out_centers = jax.block_until_ready(out_centers)
    assert out_features.shape == (B, 64, 16), out_features.shape
    assert out_centers.shape == (B, 3, 16), out_centers.shape

    # Sanity-check the Pallas MLP+max kernel against a pure-JAX f32 reference.
    # (bf16 activation streaming -> loosened tolerance vs. the exact f32 path.)
    M, K, Cin = 16, 8, 7
    grouped = jax.random.normal(k_chk, (B, M, K, Cin), jnp.float32)
    ws = [w for (w, _) in module.mlps[0]]
    bs = [b for (_, b) in module.mlps[0]]
    got = jax.block_until_ready(shared_mlp_max(grouped, ws, bs))             # (B, C, M)
    want = jnp.transpose(_ref_mlp_max(grouped, ws, bs), (0, 2, 1))           # (B, C, M)
    assert jnp.allclose(got, want, atol=5e-2, rtol=5e-2), float(jnp.max(jnp.abs(got - want)))

    print("KERNEL_OK")
</pallas_src>

<mosaic_0001>
module attributes {stable_mosaic.version = 11 : i64} {
  func.func @kernel(%arg0: i32, %arg1: i32, %arg2: memref<8x7x128xbf16, #tpu.memory_space<vmem>>, %arg3: memref<16x7xbf16, #tpu.memory_space<vmem>>, %arg4: memref<16x1xf32, #tpu.memory_space<vmem>>, %arg5: memref<32x16xbf16, #tpu.memory_space<vmem>>, %arg6: memref<32x1xf32, #tpu.memory_space<vmem>>, %arg7: memref<32x128xf32, #tpu.memory_space<vmem>>) attributes {dimension_semantics = [#tpu.dimension_semantics<parallel>, #tpu.dimension_semantics<arbitrary>], iteration_bounds = array<i64: 1, 1>, scalar_prefetch = 0 : i64, scratch_operands = 0 : i64, tpu.core_type = #tpu.core_type<tc>, window_params = [{transform_indices = @transform_0, window_bounds = array<i64: 8, 7, 128>}, {pipeline_mode = #tpu.pipeline_mode<synchronous>, transform_indices = @transform_1, window_bounds = array<i64: 16, 7>}, {pipeline_mode = #tpu.pipeline_mode<synchronous>, transform_indices = @transform_2, window_bounds = array<i64: 16, 1>}, {pipeline_mode = #tpu.pipeline_mode<synchronous>, transform_indices = @transform_3, window_bounds = array<i64: 32, 16>}, {pipeline_mode = #tpu.pipeline_mode<synchronous>, transform_indices = @transform_4, window_bounds = array<i64: 32, 1>}, {transform_indices = @transform_5, window_bounds = array<i64: 32, 128>}]} {
    %c0_i32 = arith.constant 0 : i32
    %0 = arith.cmpi eq, %arg1, %c0_i32 : i32
    %1 = arith.extui %0 : i1 to i32
    %c0_i32_0 = arith.constant 0 : i32
    %2 = arith.cmpi ne, %1, %c0_i32_0 : i32
    scf.if %2 {
      %cst_60 = arith.constant 0xFF800000 : f32
      %121 = vector.broadcast %cst_60 : f32 to vector<32x128xf32>
      %c0_61 = arith.constant 0 : index
      %c0_62 = arith.constant 0 : index
      %122 = vector.load %arg7[%c0_61, %c0_62] : memref<32x128xf32, #tpu.memory_space<vmem>>, vector<32x128xf32>
      tpu.vector_store %arg7[%c0_61, %c0_62], %121 {strides = array<i32>} : memref<32x128xf32, #tpu.memory_space<vmem>>, vector<32x128xf32>,
    } else {
    }
    %c0 = arith.constant 0 : index
    %c0_1 = arith.constant 0 : index
    %3 = vector.load %arg3[%c0, %c0_1] : memref<16x7xbf16, #tpu.memory_space<vmem>>, vector<16x7xbf16>
    %c0_2 = arith.constant 0 : index
    %c0_3 = arith.constant 0 : index
    %4 = vector.load %arg5[%c0_2, %c0_3] : memref<32x16xbf16, #tpu.memory_space<vmem>>, vector<32x16xbf16>
    %c0_4 = arith.constant 0 : index
    %c0_5 = arith.constant 0 : index
    %5 = vector.load %arg4[%c0_4, %c0_5] : memref<16x1xf32, #tpu.memory_space<vmem>>, vector<16x1xf32>
    %c0_6 = arith.constant 0 : index
    %c0_7 = arith.constant 0 : index
    %6 = vector.load %arg6[%c0_6, %c0_7] : memref<32x1xf32, #tpu.memory_space<vmem>>, vector<32x1xf32>
    %c0_8 = arith.constant 0 : index
    %c0_9 = arith.constant 0 : index
    %7 = vector.load %arg7[%c0_8, %c0_9] : memref<32x128xf32, #tpu.memory_space<vmem>>, vector<32x128xf32>
    %c0_10 = arith.constant 0 : index
    %c0_11 = arith.constant 0 : index
    %c0_12 = arith.constant 0 : index
    %8 = vector.load %arg2[%c0_10, %c0_11, %c0_12] : memref<8x7x128xbf16, #tpu.memory_space<vmem>>, vector<1x7x128xbf16>
    %9 = vector.shape_cast %8 : vector<1x7x128xbf16> to vector<7x128xbf16>
    %cst = arith.constant dense<0.000000e+00> : vector<16x128xf32>
    %10 = tpu.matmul %3, %9, %cst {dimension_numbers = #tpu.dot_dimension_numbers<[1], [0], [0], [1], [0, 0, 1, 1], [], []>} : vector<16x7xbf16>, vector<7x128xbf16>, vector<16x128xf32> -> vector<16x128xf32>
    %11 = vector.broadcast %5 : vector<16x1xf32> to vector<16x128xf32>
    %12 = arith.addf %10, %11 : vector<16x128xf32>
    %cst_13 = arith.constant 0.000000e+00 : f32
    %13 = vector.broadcast %cst_13 : f32 to vector<16x128xf32>
    %14 = arith.maximumf %12, %13 : vector<16x128xf32>
    %15 = arith.truncf %14 : vector<16x128xf32> to vector<16x128xbf16>
    %cst_14 = arith.constant dense<0.000000e+00> : vector<32x128xf32>
    %16 = tpu.matmul %4, %15, %cst_14 {dimension_numbers = #tpu.dot_dimension_numbers<[1], [0], [0], [1], [0, 0, 1, 1], [], []>} : vector<32x16xbf16>, vector<16x128xbf16>, vector<32x128xf32> -> vector<32x128xf32>
    %17 = vector.broadcast %6 : vector<32x1xf32> to vector<32x128xf32>
    %18 = arith.addf %16, %17 : vector<32x128xf32>
    %cst_15 = arith.constant 0.000000e+00 : f32
    %19 = vector.broadcast %cst_15 : f32 to vector<32x128xf32>
    %20 = arith.maximumf %18, %19 : vector<32x128xf32>
    %21 = arith.maximumf %7, %20 : vector<32x128xf32>
    %c1 = arith.constant 1 : index
    %c0_16 = arith.constant 0 : index
    %c0_17 = arith.constant 0 : index
    %22 = vector.load %arg2[%c1, %c0_16, %c0_17] : memref<8x7x128xbf16, #tpu.memory_space<vmem>>, vector<1x7x128xbf16>
    %23 = vector.shape_cast %22 : vector<1x7x128xbf16> to vector<7x128xbf16>
    %cst_18 = arith.constant dense<0.000000e+00> : vector<16x128xf32>
    %24 = tpu.matmul %3, %23, %cst_18 {dimension_numbers = #tpu.dot_dimension_numbers<[1], [0], [0], [1], [0, 0, 1, 1], [], []>} : vector<16x7xbf16>, vector<7x128xbf16>, vector<16x128xf32> -> vector<16x128xf32>
    %25 = vector.broadcast %5 : vector<16x1xf32> to vector<16x128xf32>
    %26 = arith.addf %24, %25 : vector<16x128xf32>
    %cst_19 = arith.constant 0.000000e+00 : f32
    %27 = vector.broadcast %cst_19 : f32 to vector<16x128xf32>
    %28 = arith.maximumf %26, %27 : vector<16x128xf32>
    %29 = arith.truncf %28 : vector<16x128xf32> to vector<16x128xbf16>
    %cst_20 = arith.constant dense<0.000000e+00> : vector<32x128xf32>
    %30 = tpu.matmul %4, %29, %cst_20 {dimension_numbers = #tpu.dot_dimension_numbers<[1], [0], [0], [1], [0, 0, 1, 1], [], []>} : vector<32x16xbf16>, vector<16x128xbf16>, vector<32x128xf32> -> vector<32x128xf32>
    %31 = vector.broadcast %6 : vector<32x1xf32> to vector<32x128xf32>
    %32 = arith.addf %30, %31 : vector<32x128xf32>
    %cst_21 = arith.constant 0.000000e+00 : f32
    %33 = vector.broadcast %cst_21 : f32 to vector<32x128xf32>
    %34 = arith.maximumf %32, %33 : vector<32x128xf32>
    %35 = arith.maximumf %21, %34 : vector<32x128xf32>
    %c2 = arith.constant 2 : index
    %c0_22 = arith.constant 0 : index
    %c0_23 = arith.constant 0 : index
    %36 = vector.load %arg2[%c2, %c0_22, %c0_23] : memref<8x7x128xbf16, #tpu.memory_space<vmem>>, vector<1x7x128xbf16>
    %37 = vector.shape_cast %36 : vector<1x7x128xbf16> to vector<7x128xbf16>
    %cst_24 = arith.constant dense<0.000000e+00> : vector<16x128xf32>
    %38 = tpu.matmul %3, %37, %cst_24 {dimension_numbers = #tpu.dot_dimension_numbers<[1], [0], [0], [1], [0, 0, 1, 1], [], []>} : vector<16x7xbf16>, vector<7x128xbf16>, vector<16x128xf32> -> vector<16x128xf32>
    %39 = vector.broadcast %5 : vector<16x1xf32> to vector<16x128xf32>
    %40 = arith.addf %38, %39 : vector<16x128xf32>
    %cst_25 = arith.constant 0.000000e+00 : f32
    %41 = vector.broadcast %cst_25 : f32 to vector<16x128xf32>
    %42 = arith.maximumf %40, %41 : vector<16x128xf32>
    %43 = arith.truncf %42 : vector<16x128xf32> to vector<16x128xbf16>
    %cst_26 = arith.constant dense<0.000000e+00> : vector<32x128xf32>
    %44 = tpu.matmul %4, %43, %cst_26 {dimension_numbers = #tpu.dot_dimension_numbers<[1], [0], [0], [1], [0, 0, 1, 1], [], []>} : vector<32x16xbf16>, vector<16x128xbf16>, vector<32x128xf32> -> vector<32x128xf32>
    %45 = vector.broadcast %6 : vector<32x1xf32> to vector<32x128xf32>
    %46 = arith.addf %44, %45 : vector<32x128xf32>
    %cst_27 = arith.constant 0.000000e+00 : f32
    %47 = vector.broadcast %cst_27 : f32 to vector<32x128xf32>
    %48 = arith.maximumf %46, %47 : vector<32x128xf32>
    %49 = arith.maximumf %35, %48 : vector<32x128xf32>
    %c3 = arith.constant 3 : index
    %c0_28 = arith.constant 0 : index
    %c0_29 = arith.constant 0 : index
    %50 = vector.load %arg2[%c3, %c0_28, %c0_29] : memref<8x7x128xbf16, #tpu.memory_space<vmem>>, vector<1x7x128xbf16>
    %51 = vector.shape_cast %50 : vector<1x7x128xbf16> to vector<7x128xbf16>
    %cst_30 = arith.constant dense<0.000000e+00> : vector<16x128xf32>
    %52 = tpu.matmul %3, %51, %cst_30 {dimension_numbers = #tpu.dot_dimension_numbers<[1], [0], [0], [1], [0, 0, 1, 1], [], []>} : vector<16x7xbf16>, vector<7x128xbf16>, vector<16x128xf32> -> vector<16x128xf32>
    %53 = vector.broadcast %5 : vector<16x1xf32> to vector<16x128xf32>
    %54 = arith.addf %52, %53 : vector<16x128xf32>
    %cst_31 = arith.constant 0.000000e+00 : f32
    %55 = vector.broadcast %cst_31 : f32 to vector<16x128xf32>
    %56 = arith.maximumf %54, %55 : vector<16x128xf32>
    %57 = arith.truncf %56 : vector<16x128xf32> to vector<16x128xbf16>
    %cst_32 = arith.constant dense<0.000000e+00> : vector<32x128xf32>
    %58 = tpu.matmul %4, %57, %cst_32 {dimension_numbers = #tpu.dot_dimension_numbers<[1], [0], [0], [1], [0, 0, 1, 1], [], []>} : vector<32x16xbf16>, vector<16x128xbf16>, vector<32x128xf32> -> vector<32x128xf32>
    %59 = vector.broadcast %6 : vector<32x1xf32> to vector<32x128xf32>
    %60 = arith.addf %58, %59 : vector<32x128xf32>
    %cst_33 = arith.constant 0.000000e+00 : f32
    %61 = vector.broadcast %cst_33 : f32 to vector<32x128xf32>
    %62 = arith.maximumf %60, %61 : vector<32x128xf32>
    %63 = arith.maximumf %49, %62 : vector<32x128xf32>
    %c4 = arith.constant 4 : index
    %c0_34 = arith.constant 0 : index
    %c0_35 = arith.constant 0 : index
    %64 = vector.load %arg2[%c4, %c0_34, %c0_35] : memref<8x7x128xbf16, #tpu.memory_space<vmem>>, vector<1x7x128xbf16>
    %65 = vector.shape_cast %64 : vector<1x7x128xbf16> to vector<7x128xbf16>
    %cst_36 = arith.constant dense<0.000000e+00> : vector<16x128xf32>
    %66 = tpu.matmul %3, %65, %cst_36 {dimension_numbers = #tpu.dot_dimension_numbers<[1], [0], [0], [1], [0, 0, 1, 1], [], []>} : vector<16x7xbf16>, vector<7x128xbf16>, vector<16x128xf32> -> vector<16x128xf32>
    %67 = vector.broadcast %5 : vector<16x1xf32> to vector<16x128xf32>
    %68 = arith.addf %66, %67 : vector<16x128xf32>
    %cst_37 = arith.constant 0.000000e+00 : f32
    %69 = vector.broadcast %cst_37 : f32 to vector<16x128xf32>
    %70 = arith.maximumf %68, %69 : vector<16x128xf32>
    %71 = arith.truncf %70 : vector<16x128xf32> to vector<16x128xbf16>
    %cst_38 = arith.constant dense<0.000000e+00> : vector<32x128xf32>
    %72 = tpu.matmul %4, %71, %cst_38 {dimension_numbers = #tpu.dot_dimension_numbers<[1], [0], [0], [1], [0, 0, 1, 1], [], []>} : vector<32x16xbf16>, vector<16x128xbf16>, vector<32x128xf32> -> vector<32x128xf32>
    %73 = vector.broadcast %6 : vector<32x1xf32> to vector<32x128xf32>
    %74 = arith.addf %72, %73 : vector<32x128xf32>
    %cst_39 = arith.constant 0.000000e+00 : f32
    %75 = vector.broadcast %cst_39 : f32 to vector<32x128xf32>
    %76 = arith.maximumf %74, %75 : vector<32x128xf32>
    %77 = arith.maximumf %63, %76 : vector<32x128xf32>
    %c5 = arith.constant 5 : index
    %c0_40 = arith.constant 0 : index
    %c0_41 = arith.constant 0 : index
    %78 = vector.load %arg2[%c5, %c0_40, %c0_41] : memref<8x7x128xbf16, #tpu.memory_space<vmem>>, vector<1x7x128xbf16>
    %79 = vector.shape_cast %78 : vector<1x7x128xbf16> to vector<7x128xbf16>
    %cst_42 = arith.constant dense<0.000000e+00> : vector<16x128xf32>
    %80 = tpu.matmul %3, %79, %cst_42 {dimension_numbers = #tpu.dot_dimension_numbers<[1], [0], [0], [1], [0, 0, 1, 1], [], []>} : vector<16x7xbf16>, vector<7x128xbf16>, vector<16x128xf32> -> vector<16x128xf32>
    %81 = vector.broadcast %5 : vector<16x1xf32> to vector<16x128xf32>
    %82 = arith.addf %80, %81 : vector<16x128xf32>
    %cst_43 = arith.constant 0.000000e+00 : f32
    %83 = vector.broadcast %cst_43 : f32 to vector<16x128xf32>
    %84 = arith.maximumf %82, %83 : vector<16x128xf32>
    %85 = arith.truncf %84 : vector<16x128xf32> to vector<16x128xbf16>
    %cst_44 = arith.constant dense<0.000000e+00> : vector<32x128xf32>
    %86 = tpu.matmul %4, %85, %cst_44 {dimension_numbers = #tpu.dot_dimension_numbers<[1], [0], [0], [1], [0, 0, 1, 1], [], []>} : vector<32x16xbf16>, vector<16x128xbf16>, vector<32x128xf32> -> vector<32x128xf32>
    %87 = vector.broadcast %6 : vector<32x1xf32> to vector<32x128xf32>
    %88 = arith.addf %86, %87 : vector<32x128xf32>
    %cst_45 = arith.constant 0.000000e+00 : f32
    %89 = vector.broadcast %cst_45 : f32 to vector<32x128xf32>
    %90 = arith.maximumf %88, %89 : vector<32x128xf32>
    %91 = arith.maximumf %77, %90 : vector<32x128xf32>
    %c6 = arith.constant 6 : index
    %c0_46 = arith.constant 0 : index
    %c0_47 = arith.constant 0 : index
    %92 = vector.load %arg2[%c6, %c0_46, %c0_47] : memref<8x7x128xbf16, #tpu.memory_space<vmem>>, vector<1x7x128xbf16>
    %93 = vector.shape_cast %92 : vector<1x7x128xbf16> to vector<7x128xbf16>
    %cst_48 = arith.constant dense<0.000000e+00> : vector<16x128xf32>
    %94 = tpu.matmul %3, %93, %cst_48 {dimension_numbers = #tpu.dot_dimension_numbers<[1], [0], [0], [1], [0, 0, 1, 1], [], []>} : vector<16x7xbf16>, vector<7x128xbf16>, vector<16x128xf32> -> vector<16x128xf32>
    %95 = vector.broadcast %5 : vector<16x1xf32> to vector<16x128xf32>
    %96 = arith.addf %94, %95 : vector<16x128xf32>
    %cst_49 = arith.constant 0.000000e+00 : f32
    %97 = vector.broadcast %cst_49 : f32 to vector<16x128xf32>
    %98 = arith.maximumf %96, %97 : vector<16x128xf32>
    %99 = arith.truncf %98 : vector<16x128xf32> to vector<16x128xbf16>
    %cst_50 = arith.constant dense<0.000000e+00> : vector<32x128xf32>
    %100 = tpu.matmul %4, %99, %cst_50 {dimension_numbers = #tpu.dot_dimension_numbers<[1], [0], [0], [1], [0, 0, 1, 1], [], []>} : vector<32x16xbf16>, vector<16x128xbf16>, vector<32x128xf32> -> vector<32x128xf32>
    %101 = vector.broadcast %6 : vector<32x1xf32> to vector<32x128xf32>
    %102 = arith.addf %100, %101 : vector<32x128xf32>
    %cst_51 = arith.constant 0.000000e+00 : f32
    %103 = vector.broadcast %cst_51 : f32 to vector<32x128xf32>
    %104 = arith.maximumf %102, %103 : vector<32x128xf32>
    %105 = arith.maximumf %91, %104 : vector<32x128xf32>
    %c7 = arith.constant 7 : index
    %c0_52 = arith.constant 0 : index
    %c0_53 = arith.constant 0 : index
    %106 = vector.load %arg2[%c7, %c0_52, %c0_53] : memref<8x7x128xbf16, #tpu.memory_space<vmem>>, vector<1x7x128xbf16>
    %107 = vector.shape_cast %106 : vector<1x7x128xbf16> to vector<7x128xbf16>
    %cst_54 = arith.constant dense<0.000000e+00> : vector<16x128xf32>
    %108 = tpu.matmul %3, %107, %cst_54 {dimension_numbers = #tpu.dot_dimension_numbers<[1], [0], [0], [1], [0, 0, 1, 1], [], []>} : vector<16x7xbf16>, vector<7x128xbf16>, vector<16x128xf32> -> vector<16x128xf32>
    %109 = vector.broadcast %5 : vector<16x1xf32> to vector<16x128xf32>
    %110 = arith.addf %108, %109 : vector<16x128xf32>
    %cst_55 = arith.constant 0.000000e+00 : f32
    %111 = vector.broadcast %cst_55 : f32 to vector<16x128xf32>
    %112 = arith.maximumf %110, %111 : vector<16x128xf32>
    %113 = arith.truncf %112 : vector<16x128xf32> to vector<16x128xbf16>
    %cst_56 = arith.constant dense<0.000000e+00> : vector<32x128xf32>
    %114 = tpu.matmul %4, %113, %cst_56 {dimension_numbers = #tpu.dot_dimension_numbers<[1], [0], [0], [1], [0, 0, 1, 1], [], []>} : vector<32x16xbf16>, vector<16x128xbf16>, vector<32x128xf32> -> vector<32x128xf32>
    %115 = vector.broadcast %6 : vector<32x1xf32> to vector<32x128xf32>
    %116 = arith.addf %114, %115 : vector<32x128xf32>
    %cst_57 = arith.constant 0.000000e+00 : f32
    %117 = vector.broadcast %cst_57 : f32 to vector<32x128xf32>
    %118 = arith.maximumf %116, %117 : vector<32x128xf32>
    %119 = arith.maximumf %105, %118 : vector<32x128xf32>
    %c0_58 = arith.constant 0 : index
    %c0_59 = arith.constant 0 : index
    %120 = vector.load %arg7[%c0_58, %c0_59] : memref<32x128xf32, #tpu.memory_space<vmem>>, vector<32x128xf32>
    tpu.vector_store %arg7[%c0_58, %c0_59], %119 {strides = array<i32>} : memref<32x128xf32, #tpu.memory_space<vmem>>, vector<32x128xf32>,
    return
  }
  func.func @transform_0(%arg0: i32, %arg1: i32) -> (i32, i32, i32) {
    %c0_i32 = arith.constant 0 : i32
    %c0_i32_0 = arith.constant 0 : i32
    return %arg1, %c0_i32, %arg0 : i32, i32, i32
  }
  func.func @transform_1(%arg0: i32, %arg1: i32) -> (i32, i32) {
    %c0_i32 = arith.constant 0 : i32
    %c0_i32_0 = arith.constant 0 : i32
    %c0_i32_1 = arith.constant 0 : i32
    return %c0_i32, %c0_i32_0 : i32, i32
  }
  func.func @transform_2(%arg0: i32, %arg1: i32) -> (i32, i32) {
    %c0_i32 = arith.constant 0 : i32
    %c0_i32_0 = arith.constant 0 : i32
    %c0_i32_1 = arith.constant 0 : i32
    return %c0_i32, %c0_i32_0 : i32, i32
  }
  func.func @transform_3(%arg0: i32, %arg1: i32) -> (i32, i32) {
    %c0_i32 = arith.constant 0 : i32
    %c0_i32_0 = arith.constant 0 : i32
    %c0_i32_1 = arith.constant 0 : i32
    return %c0_i32, %c0_i32_0 : i32, i32
  }
  func.func @transform_4(%arg0: i32, %arg1: i32) -> (i32, i32) {
    %c0_i32 = arith.constant 0 : i32
    %c0_i32_0 = arith.constant 0 : i32
    %c0_i32_1 = arith.constant 0 : i32
    return %c0_i32, %c0_i32_0 : i32, i32
  }
  func.func @transform_5(%arg0: i32, %arg1: i32) -> (i32, i32) {
    %c0_i32 = arith.constant 0 : i32
    %c0_i32_0 = arith.constant 0 : i32
    return %c0_i32, %arg0 : i32, i32
  }
}

module attributes {stable_mosaic.version = 11 : i64} {
  func.func @kernel(%arg0: i32, %arg1: i32, %arg2: memref<16x7x128xbf16, #tpu.memory_space<vmem>>, %arg3: memref<16x7xbf16, #tpu.memory_space<vmem>>, %arg4: memref<16x1xf32, #tpu.memory_space<vmem>>, %arg5: memref<32x16xbf16, #tpu.memory_space<vmem>>, %arg6: memref<32x1xf32, #tpu.memory_space<vmem>>, %arg7: memref<32x128xf32, #tpu.memory_space<vmem>>) attributes {dimension_semantics = [#tpu.dimension_semantics<parallel>, #tpu.dimension_semantics<arbitrary>], iteration_bounds = array<i64: 1, 1>, scalar_prefetch = 0 : i64, scratch_operands = 0 : i64, tpu.core_type = #tpu.core_type<tc>, window_params = [{transform_indices = @transform_0, window_bounds = array<i64: 16, 7, 128>}, {pipeline_mode = #tpu.pipeline_mode<synchronous>, transform_indices = @transform_1, window_bounds = array<i64: 16, 7>}, {pipeline_mode = #tpu.pipeline_mode<synchronous>, transform_indices = @transform_2, window_bounds = array<i64: 16, 1>}, {pipeline_mode = #tpu.pipeline_mode<synchronous>, transform_indices = @transform_3, window_bounds = array<i64: 32, 16>}, {pipeline_mode = #tpu.pipeline_mode<synchronous>, transform_indices = @transform_4, window_bounds = array<i64: 32, 1>}, {transform_indices = @transform_5, window_bounds = array<i64: 32, 128>}]} {
    %c0_i32 = arith.constant 0 : i32
    %0 = arith.cmpi eq, %arg1, %c0_i32 : i32
    %1 = arith.extui %0 : i1 to i32
    %c0_i32_0 = arith.constant 0 : i32
    %2 = arith.cmpi ne, %1, %c0_i32_0 : i32
    scf.if %2 {
      %cst_108 = arith.constant 0xFF800000 : f32
      %233 = vector.broadcast %cst_108 : f32 to vector<32x128xf32>
      %c0_109 = arith.constant 0 : index
      %c0_110 = arith.constant 0 : index
      %234 = vector.load %arg7[%c0_109, %c0_110] : memref<32x128xf32, #tpu.memory_space<vmem>>, vector<32x128xf32>
      tpu.vector_store %arg7[%c0_109, %c0_110], %233 {strides = array<i32>} : memref<32x128xf32, #tpu.memory_space<vmem>>, vector<32x128xf32>,
    } else {
    }
    %c0 = arith.constant 0 : index
    %c0_1 = arith.constant 0 : index
    %3 = vector.load %arg3[%c0, %c0_1] : memref<16x7xbf16, #tpu.memory_space<vmem>>, vector<16x7xbf16>
    %c0_2 = arith.constant 0 : index
    %c0_3 = arith.constant 0 : index
    %4 = vector.load %arg5[%c0_2, %c0_3] : memref<32x16xbf16, #tpu.memory_space<vmem>>, vector<32x16xbf16>
    %c0_4 = arith.constant 0 : index
    %c0_5 = arith.constant 0 : index
    %5 = vector.load %arg4[%c0_4, %c0_5] : memref<16x1xf32, #tpu.memory_space<vmem>>, vector<16x1xf32>
    %c0_6 = arith.constant 0 : index
    %c0_7 = arith.constant 0 : index
    %6 = vector.load %arg6[%c0_6, %c0_7] : memref<32x1xf32, #tpu.memory_space<vmem>>, vector<32x1xf32>
    %c0_8 = arith.constant 0 : index
    %c0_9 = arith.constant 0 : index
    %7 = vector.load %arg7[%c0_8, %c0_9] : memref<32x128xf32, #tpu.memory_space<vmem>>, vector<32x128xf32>
    %c0_10 = arith.constant 0 : index
    %c0_11 = arith.constant 0 : index
    %c0_12 = arith.constant 0 : index
    %8 = vector.load %arg2[%c0_10, %c0_11, %c0_12] : memref<16x7x128xbf16, #tpu.memory_space<vmem>>, vector<1x7x128xbf16>
    %9 = vector.shape_cast %8 : vector<1x7x128xbf16> to vector<7x128xbf16>
    %cst = arith.constant dense<0.000000e+00> : vector<16x128xf32>
    %10 = tpu.matmul %3, %9, %cst {dimension_numbers = #tpu.dot_dimension_numbers<[1], [0], [0], [1], [0, 0, 1, 1], [], []>} : vector<16x7xbf16>, vector<7x128xbf16>, vector<16x128xf32> -> vector<16x128xf32>
    %11 = vector.broadcast %5 : vector<16x1xf32> to vector<16x128xf32>
    %12 = arith.addf %10, %11 : vector<16x128xf32>
    %cst_13 = arith.constant 0.000000e+00 : f32
    %13 = vector.broadcast %cst_13 : f32 to vector<16x128xf32>
    %14 = arith.maximumf %12, %13 : vector<16x128xf32>
    %15 = arith.truncf %14 : vector<16x128xf32> to vector<16x128xbf16>
    %cst_14 = arith.constant dense<0.000000e+00> : vector<32x128xf32>
    %16 = tpu.matmul %4, %15, %cst_14 {dimension_numbers = #tpu.dot_dimension_numbers<[1], [0], [0], [1], [0, 0, 1, 1], [], []>} : vector<32x16xbf16>, vector<16x128xbf16>, vector<32x128xf32> -> vector<32x128xf32>
    %17 = vector.broadcast %6 : vector<32x1xf32> to vector<32x128xf32>
    %18 = arith.addf %16, %17 : vector<32x128xf32>
    %cst_15 = arith.constant 0.000000e+00 : f32
    %19 = vector.broadcast %cst_15 : f32 to vector<32x128xf32>
    %20 = arith.maximumf %18, %19 : vector<32x128xf32>
    %21 = arith.maximumf %7, %20 : vector<32x128xf32>
    %c1 = arith.constant 1 : index
    %c0_16 = arith.constant 0 : index
    %c0_17 = arith.constant 0 : index
    %22 = vector.load %arg2[%c1, %c0_16, %c0_17] : memref<16x7x128xbf16, #tpu.memory_space<vmem>>, vector<1x7x128xbf16>
    %23 = vector.shape_cast %22 : vector<1x7x128xbf16> to vector<7x128xbf16>
    %cst_18 = arith.constant dense<0.000000e+00> : vector<16x128xf32>
    %24 = tpu.matmul %3, %23, %cst_18 {dimension_numbers = #tpu.dot_dimension_numbers<[1], [0], [0], [1], [0, 0, 1, 1], [], []>} : vector<16x7xbf16>, vector<7x128xbf16>, vector<16x128xf32> -> vector<16x128xf32>
    %25 = vector.broadcast %5 : vector<16x1xf32> to vector<16x128xf32>
    %26 = arith.addf %24, %25 : vector<16x128xf32>
    %cst_19 = arith.constant 0.000000e+00 : f32
    %27 = vector.broadcast %cst_19 : f32 to vector<16x128xf32>
    %28 = arith.maximumf %26, %27 : vector<16x128xf32>
    %29 = arith.truncf %28 : vector<16x128xf32> to vector<16x128xbf16>
    %cst_20 = arith.constant dense<0.000000e+00> : vector<32x128xf32>
    %30 = tpu.matmul %4, %29, %cst_20 {dimension_numbers = #tpu.dot_dimension_numbers<[1], [0], [0], [1], [0, 0, 1, 1], [], []>} : vector<32x16xbf16>, vector<16x128xbf16>, vector<32x128xf32> -> vector<32x128xf32>
    %31 = vector.broadcast %6 : vector<32x1xf32> to vector<32x128xf32>
    %32 = arith.addf %30, %31 : vector<32x128xf32>
    %cst_21 = arith.constant 0.000000e+00 : f32
    %33 = vector.broadcast %cst_21 : f32 to vector<32x128xf32>
    %34 = arith.maximumf %32, %33 : vector<32x128xf32>
    %35 = arith.maximumf %21, %34 : vector<32x128xf32>
    %c2 = arith.constant 2 : index
    %c0_22 = arith.constant 0 : index
    %c0_23 = arith.constant 0 : index
    %36 = vector.load %arg2[%c2, %c0_22, %c0_23] : memref<16x7x128xbf16, #tpu.memory_space<vmem>>, vector<1x7x128xbf16>
    %37 = vector.shape_cast %36 : vector<1x7x128xbf16> to vector<7x128xbf16>
    %cst_24 = arith.constant dense<0.000000e+00> : vector<16x128xf32>
    %38 = tpu.matmul %3, %37, %cst_24 {dimension_numbers = #tpu.dot_dimension_numbers<[1], [0], [0], [1], [0, 0, 1, 1], [], []>} : vector<16x7xbf16>, vector<7x128xbf16>, vector<16x128xf32> -> vector<16x128xf32>
    %39 = vector.broadcast %5 : vector<16x1xf32> to vector<16x128xf32>
    %40 = arith.addf %38, %39 : vector<16x128xf32>
    %cst_25 = arith.constant 0.000000e+00 : f32
    %41 = vector.broadcast %cst_25 : f32 to vector<16x128xf32>
    %42 = arith.maximumf %40, %41 : vector<16x128xf32>
    %43 = arith.truncf %42 : vector<16x128xf32> to vector<16x128xbf16>
    %cst_26 = arith.constant dense<0.000000e+00> : vector<32x128xf32>
    %44 = tpu.matmul %4, %43, %cst_26 {dimension_numbers = #tpu.dot_dimension_numbers<[1], [0], [0], [1], [0, 0, 1, 1], [], []>} : vector<32x16xbf16>, vector<16x128xbf16>, vector<32x128xf32> -> vector<32x128xf32>
    %45 = vector.broadcast %6 : vector<32x1xf32> to vector<32x128xf32>
    %46 = arith.addf %44, %45 : vector<32x128xf32>
    %cst_27 = arith.constant 0.000000e+00 : f32
    %47 = vector.broadcast %cst_27 : f32 to vector<32x128xf32>
    %48 = arith.maximumf %46, %47 : vector<32x128xf32>
    %49 = arith.maximumf %35, %48 : vector<32x128xf32>
    %c3 = arith.constant 3 : index
    %c0_28 = arith.constant 0 : index
    %c0_29 = arith.constant 0 : index
    %50 = vector.load %arg2[%c3, %c0_28, %c0_29] : memref<16x7x128xbf16, #tpu.memory_space<vmem>>, vector<1x7x128xbf16>
    %51 = vector.shape_cast %50 : vector<1x7x128xbf16> to vector<7x128xbf16>
    %cst_30 = arith.constant dense<0.000000e+00> : vector<16x128xf32>
    %52 = tpu.matmul %3, %51, %cst_30 {dimension_numbers = #tpu.dot_dimension_numbers<[1], [0], [0], [1], [0, 0, 1, 1], [], []>} : vector<16x7xbf16>, vector<7x128xbf16>, vector<16x128xf32> -> vector<16x128xf32>
    %53 = vector.broadcast %5 : vector<16x1xf32> to vector<16x128xf32>
    %54 = arith.addf %52, %53 : vector<16x128xf32>
    %cst_31 = arith.constant 0.000000e+00 : f32
    %55 = vector.broadcast %cst_31 : f32 to vector<16x128xf32>
    %56 = arith.maximumf %54, %55 : vector<16x128xf32>
    %57 = arith.truncf %56 : vector<16x128xf32> to vector<16x128xbf16>
    %cst_32 = arith.constant dense<0.000000e+00> : vector<32x128xf32>
    %58 = tpu.matmul %4, %57, %cst_32 {dimension_numbers = #tpu.dot_dimension_numbers<[1], [0], [0], [1], [0, 0, 1, 1], [], []>} : vector<32x16xbf16>, vector<16x128xbf16>, vector<32x128xf32> -> vector<32x128xf32>
    %59 = vector.broadcast %6 : vector<32x1xf32> to vector<32x128xf32>
    %60 = arith.addf %58, %59 : vector<32x128xf32>
    %cst_33 = arith.constant 0.000000e+00 : f32
    %61 = vector.broadcast %cst_33 : f32 to vector<32x128xf32>
    %62 = arith.maximumf %60, %61 : vector<32x128xf32>
    %63 = arith.maximumf %49, %62 : vector<32x128xf32>
    %c4 = arith.constant 4 : index
    %c0_34 = arith.constant 0 : index
    %c0_35 = arith.constant 0 : index
    %64 = vector.load %arg2[%c4, %c0_34, %c0_35] : memref<16x7x128xbf16, #tpu.memory_space<vmem>>, vector<1x7x128xbf16>
    %65 = vector.shape_cast %64 : vector<1x7x128xbf16> to vector<7x128xbf16>
    %cst_36 = arith.constant dense<0.000000e+00> : vector<16x128xf32>
    %66 = tpu.matmul %3, %65, %cst_36 {dimension_numbers = #tpu.dot_dimension_numbers<[1], [0], [0], [1], [0, 0, 1, 1], [], []>} : vector<16x7xbf16>, vector<7x128xbf16>, vector<16x128xf32> -> vector<16x128xf32>
    %67 = vector.broadcast %5 : vector<16x1xf32> to vector<16x128xf32>
    %68 = arith.addf %66, %67 : vector<16x128xf32>
    %cst_37 = arith.constant 0.000000e+00 : f32
    %69 = vector.broadcast %cst_37 : f32 to vector<16x128xf32>
    %70 = arith.maximumf %68, %69 : vector<16x128xf32>
    %71 = arith.truncf %70 : vector<16x128xf32> to vector<16x128xbf16>
    %cst_38 = arith.constant dense<0.000000e+00> : vector<32x128xf32>
    %72 = tpu.matmul %4, %71, %cst_38 {dimension_numbers = #tpu.dot_dimension_numbers<[1], [0], [0], [1], [0, 0, 1, 1], [], []>} : vector<32x16xbf16>, vector<16x128xbf16>, vector<32x128xf32> -> vector<32x128xf32>
    %73 = vector.broadcast %6 : vector<32x1xf32> to vector<32x128xf32>
    %74 = arith.addf %72, %73 : vector<32x128xf32>
    %cst_39 = arith.constant 0.000000e+00 : f32
    %75 = vector.broadcast %cst_39 : f32 to vector<32x128xf32>
    %76 = arith.maximumf %74, %75 : vector<32x128xf32>
    %77 = arith.maximumf %63, %76 : vector<32x128xf32>
    %c5 = arith.constant 5 : index
    %c0_40 = arith.constant 0 : index
    %c0_41 = arith.constant 0 : index
    %78 = vector.load %arg2[%c5, %c0_40, %c0_41] : memref<16x7x128xbf16, #tpu.memory_space<vmem>>, vector<1x7x128xbf16>
    %79 = vector.shape_cast %78 : vector<1x7x128xbf16> to vector<7x128xbf16>
    %cst_42 = arith.constant dense<0.000000e+00> : vector<16x128xf32>
    %80 = tpu.matmul %3, %79, %cst_42 {dimension_numbers = #tpu.dot_dimension_numbers<[1], [0], [0], [1], [0, 0, 1, 1], [], []>} : vector<16x7xbf16>, vector<7x128xbf16>, vector<16x128xf32> -> vector<16x128xf32>
    %81 = vector.broadcast %5 : vector<16x1xf32> to vector<16x128xf32>
    %82 = arith.addf %80, %81 : vector<16x128xf32>
    %cst_43 = arith.constant 0.000000e+00 : f32
    %83 = vector.broadcast %cst_43 : f32 to vector<16x128xf32>
    %84 = arith.maximumf %82, %83 : vector<16x128xf32>
    %85 = arith.truncf %84 : vector<16x128xf32> to vector<16x128xbf16>
    %cst_44 = arith.constant dense<0.000000e+00> : vector<32x128xf32>
    %86 = tpu.matmul %4, %85, %cst_44 {dimension_numbers = #tpu.dot_dimension_numbers<[1], [0], [0], [1], [0, 0, 1, 1], [], []>} : vector<32x16xbf16>, vector<16x128xbf16>, vector<32x128xf32> -> vector<32x128xf32>
    %87 = vector.broadcast %6 : vector<32x1xf32> to vector<32x128xf32>
    %88 = arith.addf %86, %87 : vector<32x128xf32>
    %cst_45 = arith.constant 0.000000e+00 : f32
    %89 = vector.broadcast %cst_45 : f32 to vector<32x128xf32>
    %90 = arith.maximumf %88, %89 : vector<32x128xf32>
    %91 = arith.maximumf %77, %90 : vector<32x128xf32>
    %c6 = arith.constant 6 : index
    %c0_46 = arith.constant 0 : index
    %c0_47 = arith.constant 0 : index
    %92 = vector.load %arg2[%c6, %c0_46, %c0_47] : memref<16x7x128xbf16, #tpu.memory_space<vmem>>, vector<1x7x128xbf16>
    %93 = vector.shape_cast %92 : vector<1x7x128xbf16> to vector<7x128xbf16>
    %cst_48 = arith.constant dense<0.000000e+00> : vector<16x128xf32>
    %94 = tpu.matmul %3, %93, %cst_48 {dimension_numbers = #tpu.dot_dimension_numbers<[1], [0], [0], [1], [0, 0, 1, 1], [], []>} : vector<16x7xbf16>, vector<7x128xbf16>, vector<16x128xf32> -> vector<16x128xf32>
    %95 = vector.broadcast %5 : vector<16x1xf32> to vector<16x128xf32>
    %96 = arith.addf %94, %95 : vector<16x128xf32>
    %cst_49 = arith.constant 0.000000e+00 : f32
    %97 = vector.broadcast %cst_49 : f32 to vector<16x128xf32>
    %98 = arith.maximumf %96, %97 : vector<16x128xf32>
    %99 = arith.truncf %98 : vector<16x128xf32> to vector<16x128xbf16>
    %cst_50 = arith.constant dense<0.000000e+00> : vector<32x128xf32>
    %100 = tpu.matmul %4, %99, %cst_50 {dimension_numbers = #tpu.dot_dimension_numbers<[1], [0], [0], [1], [0, 0, 1, 1], [], []>} : vector<32x16xbf16>, vector<16x128xbf16>, vector<32x128xf32> -> vector<32x128xf32>
    %101 = vector.broadcast %6 : vector<32x1xf32> to vector<32x128xf32>
    %102 = arith.addf %100, %101 : vector<32x128xf32>
    %cst_51 = arith.constant 0.000000e+00 : f32
    %103 = vector.broadcast %cst_51 : f32 to vector<32x128xf32>
    %104 = arith.maximumf %102, %103 : vector<32x128xf32>
    %105 = arith.maximumf %91, %104 : vector<32x128xf32>
    %c7 = arith.constant 7 : index
    %c0_52 = arith.constant 0 : index
    %c0_53 = arith.constant 0 : index
    %106 = vector.load %arg2[%c7, %c0_52, %c0_53] : memref<16x7x128xbf16, #tpu.memory_space<vmem>>, vector<1x7x128xbf16>
    %107 = vector.shape_cast %106 : vector<1x7x128xbf16> to vector<7x128xbf16>
    %cst_54 = arith.constant dense<0.000000e+00> : vector<16x128xf32>
    %108 = tpu.matmul %3, %107, %cst_54 {dimension_numbers = #tpu.dot_dimension_numbers<[1], [0], [0], [1], [0, 0, 1, 1], [], []>} : vector<16x7xbf16>, vector<7x128xbf16>, vector<16x128xf32> -> vector<16x128xf32>
    %109 = vector.broadcast %5 : vector<16x1xf32> to vector<16x128xf32>
    %110 = arith.addf %108, %109 : vector<16x128xf32>
    %cst_55 = arith.constant 0.000000e+00 : f32
    %111 = vector.broadcast %cst_55 : f32 to vector<16x128xf32>
    %112 = arith.maximumf %110, %111 : vector<16x128xf32>
    %113 = arith.truncf %112 : vector<16x128xf32> to vector<16x128xbf16>
    %cst_56 = arith.constant dense<0.000000e+00> : vector<32x128xf32>
    %114 = tpu.matmul %4, %113, %cst_56 {dimension_numbers = #tpu.dot_dimension_numbers<[1], [0], [0], [1], [0, 0, 1, 1], [], []>} : vector<32x16xbf16>, vector<16x128xbf16>, vector<32x128xf32> -> vector<32x128xf32>
    %115 = vector.broadcast %6 : vector<32x1xf32> to vector<32x128xf32>
    %116 = arith.addf %114, %115 : vector<32x128xf32>
    %cst_57 = arith.constant 0.000000e+00 : f32
    %117 = vector.broadcast %cst_57 : f32 to vector<32x128xf32>
    %118 = arith.maximumf %116, %117 : vector<32x128xf32>
    %119 = arith.maximumf %105, %118 : vector<32x128xf32>
    %c8 = arith.constant 8 : index
    %c0_58 = arith.constant 0 : index
    %c0_59 = arith.constant 0 : index
    %120 = vector.load %arg2[%c8, %c0_58, %c0_59] : memref<16x7x128xbf16, #tpu.memory_space<vmem>>, vector<1x7x128xbf16>
    %121 = vector.shape_cast %120 : vector<1x7x128xbf16> to vector<7x128xbf16>
    %cst_60 = arith.constant dense<0.000000e+00> : vector<16x128xf32>
    %122 = tpu.matmul %3, %121, %cst_60 {dimension_numbers = #tpu.dot_dimension_numbers<[1], [0], [0], [1], [0, 0, 1, 1], [], []>} : vector<16x7xbf16>, vector<7x128xbf16>, vector<16x128xf32> -> vector<16x128xf32>
    %123 = vector.broadcast %5 : vector<16x1xf32> to vector<16x128xf32>
    %124 = arith.addf %122, %123 : vector<16x128xf32>
    %cst_61 = arith.constant 0.000000e+00 : f32
    %125 = vector.broadcast %cst_61 : f32 to vector<16x128xf32>
    %126 = arith.maximumf %124, %125 : vector<16x128xf32>
    %127 = arith.truncf %126 : vector<16x128xf32> to vector<16x128xbf16>
    %cst_62 = arith.constant dense<0.000000e+00> : vector<32x128xf32>
    %128 = tpu.matmul %4, %127, %cst_62 {dimension_numbers = #tpu.dot_dimension_numbers<[1], [0], [0], [1], [0, 0, 1, 1], [], []>} : vector<32x16xbf16>, vector<16x128xbf16>, vector<32x128xf32> -> vector<32x128xf32>
    %129 = vector.broadcast %6 : vector<32x1xf32> to vector<32x128xf32>
    %130 = arith.addf %128, %129 : vector<32x128xf32>
    %cst_63 = arith.constant 0.000000e+00 : f32
    %131 = vector.broadcast %cst_63 : f32 to vector<32x128xf32>
    %132 = arith.maximumf %130, %131 : vector<32x128xf32>
    %133 = arith.maximumf %119, %132 : vector<32x128xf32>
    %c9 = arith.constant 9 : index
    %c0_64 = arith.constant 0 : index
    %c0_65 = arith.constant 0 : index
    %134 = vector.load %arg2[%c9, %c0_64, %c0_65] : memref<16x7x128xbf16, #tpu.memory_space<vmem>>, vector<1x7x128xbf16>
    %135 = vector.shape_cast %134 : vector<1x7x128xbf16> to vector<7x128xbf16>
    %cst_66 = arith.constant dense<0.000000e+00> : vector<16x128xf32>
    %136 = tpu.matmul %3, %135, %cst_66 {dimension_numbers = #tpu.dot_dimension_numbers<[1], [0], [0], [1], [0, 0, 1, 1], [], []>} : vector<16x7xbf16>, vector<7x128xbf16>, vector<16x128xf32> -> vector<16x128xf32>
    %137 = vector.broadcast %5 : vector<16x1xf32> to vector<16x128xf32>
    %138 = arith.addf %136, %137 : vector<16x128xf32>
    %cst_67 = arith.constant 0.000000e+00 : f32
    %139 = vector.broadcast %cst_67 : f32 to vector<16x128xf32>
    %140 = arith.maximumf %138, %139 : vector<16x128xf32>
    %141 = arith.truncf %140 : vector<16x128xf32> to vector<16x128xbf16>
    %cst_68 = arith.constant dense<0.000000e+00> : vector<32x128xf32>
    %142 = tpu.matmul %4, %141, %cst_68 {dimension_numbers = #tpu.dot_dimension_numbers<[1], [0], [0], [1], [0, 0, 1, 1], [], []>} : vector<32x16xbf16>, vector<16x128xbf16>, vector<32x128xf32> -> vector<32x128xf32>
    %143 = vector.broadcast %6 : vector<32x1xf32> to vector<32x128xf32>
    %144 = arith.addf %142, %143 : vector<32x128xf32>
    %cst_69 = arith.constant 0.000000e+00 : f32
    %145 = vector.broadcast %cst_69 : f32 to vector<32x128xf32>
    %146 = arith.maximumf %144, %145 : vector<32x128xf32>
    %147 = arith.maximumf %133, %146 : vector<32x128xf32>
    %c10 = arith.constant 10 : index
    %c0_70 = arith.constant 0 : index
    %c0_71 = arith.constant 0 : index
    %148 = vector.load %arg2[%c10, %c0_70, %c0_71] : memref<16x7x128xbf16, #tpu.memory_space<vmem>>, vector<1x7x128xbf16>
    %149 = vector.shape_cast %148 : vector<1x7x128xbf16> to vector<7x128xbf16>
    %cst_72 = arith.constant dense<0.000000e+00> : vector<16x128xf32>
    %150 = tpu.matmul %3, %149, %cst_72 {dimension_numbers = #tpu.dot_dimension_numbers<[1], [0], [0], [1], [0, 0, 1, 1], [], []>} : vector<16x7xbf16>, vector<7x128xbf16>, vector<16x128xf32> -> vector<16x128xf32>
    %151 = vector.broadcast %5 : vector<16x1xf32> to vector<16x128xf32>
    %152 = arith.addf %150, %151 : vector<16x128xf32>
    %cst_73 = arith.constant 0.000000e+00 : f32
    %153 = vector.broadcast %cst_73 : f32 to vector<16x128xf32>
    %154 = arith.maximumf %152, %153 : vector<16x128xf32>
    %155 = arith.truncf %154 : vector<16x128xf32> to vector<16x128xbf16>
    %cst_74 = arith.constant dense<0.000000e+00> : vector<32x128xf32>
    %156 = tpu.matmul %4, %155, %cst_74 {dimension_numbers = #tpu.dot_dimension_numbers<[1], [0], [0], [1], [0, 0, 1, 1], [], []>} : vector<32x16xbf16>, vector<16x128xbf16>, vector<32x128xf32> -> vector<32x128xf32>
    %157 = vector.broadcast %6 : vector<32x1xf32> to vector<32x128xf32>
    %158 = arith.addf %156, %157 : vector<32x128xf32>
    %cst_75 = arith.constant 0.000000e+00 : f32
    %159 = vector.broadcast %cst_75 : f32 to vector<32x128xf32>
    %160 = arith.maximumf %158, %159 : vector<32x128xf32>
    %161 = arith.maximumf %147, %160 : vector<32x128xf32>
    %c11 = arith.constant 11 : index
    %c0_76 = arith.constant 0 : index
    %c0_77 = arith.constant 0 : index
    %162 = vector.load %arg2[%c11, %c0_76, %c0_77] : memref<16x7x128xbf16, #tpu.memory_space<vmem>>, vector<1x7x128xbf16>
    %163 = vector.shape_cast %162 : vector<1x7x128xbf16> to vector<7x128xbf16>
    %cst_78 = arith.constant dense<0.000000e+00> : vector<16x128xf32>
    %164 = tpu.matmul %3, %163, %cst_78 {dimension_numbers = #tpu.dot_dimension_numbers<[1], [0], [0], [1], [0, 0, 1, 1], [], []>} : vector<16x7xbf16>, vector<7x128xbf16>, vector<16x128xf32> -> vector<16x128xf32>
    %165 = vector.broadcast %5 : vector<16x1xf32> to vector<16x128xf32>
    %166 = arith.addf %164, %165 : vector<16x128xf32>
    %cst_79 = arith.constant 0.000000e+00 : f32
    %167 = vector.broadcast %cst_79 : f32 to vector<16x128xf32>
    %168 = arith.maximumf %166, %167 : vector<16x128xf32>
    %169 = arith.truncf %168 : vector<16x128xf32> to vector<16x128xbf16>
    %cst_80 = arith.constant dense<0.000000e+00> : vector<32x128xf32>
    %170 = tpu.matmul %4, %169, %cst_80 {dimension_numbers = #tpu.dot_dimension_numbers<[1], [0], [0], [1], [0, 0, 1, 1], [], []>} : vector<32x16xbf16>, vector<16x128xbf16>, vector<32x128xf32> -> vector<32x128xf32>
    %171 = vector.broadcast %6 : vector<32x1xf32> to vector<32x128xf32>
    %172 = arith.addf %170, %171 : vector<32x128xf32>
    %cst_81 = arith.constant 0.000000e+00 : f32
    %173 = vector.broadcast %cst_81 : f32 to vector<32x128xf32>
    %174 = arith.maximumf %172, %173 : vector<32x128xf32>
    %175 = arith.maximumf %161, %174 : vector<32x128xf32>
    %c12 = arith.constant 12 : index
    %c0_82 = arith.constant 0 : index
    %c0_83 = arith.constant 0 : index
    %176 = vector.load %arg2[%c12, %c0_82, %c0_83] : memref<16x7x128xbf16, #tpu.memory_space<vmem>>, vector<1x7x128xbf16>
    %177 = vector.shape_cast %176 : vector<1x7x128xbf16> to vector<7x128xbf16>
    %cst_84 = arith.constant dense<0.000000e+00> : vector<16x128xf32>
    %178 = tpu.matmul %3, %177, %cst_84 {dimension_numbers = #tpu.dot_dimension_numbers<[1], [0], [0], [1], [0, 0, 1, 1], [], []>} : vector<16x7xbf16>, vector<7x128xbf16>, vector<16x128xf32> -> vector<16x128xf32>
    %179 = vector.broadcast %5 : vector<16x1xf32> to vector<16x128xf32>
    %180 = arith.addf %178, %179 : vector<16x128xf32>
    %cst_85 = arith.constant 0.000000e+00 : f32
    %181 = vector.broadcast %cst_85 : f32 to vector<16x128xf32>
    %182 = arith.maximumf %180, %181 : vector<16x128xf32>
    %183 = arith.truncf %182 : vector<16x128xf32> to vector<16x128xbf16>
    %cst_86 = arith.constant dense<0.000000e+00> : vector<32x128xf32>
    %184 = tpu.matmul %4, %183, %cst_86 {dimension_numbers = #tpu.dot_dimension_numbers<[1], [0], [0], [1], [0, 0, 1, 1], [], []>} : vector<32x16xbf16>, vector<16x128xbf16>, vector<32x128xf32> -> vector<32x128xf32>
    %185 = vector.broadcast %6 : vector<32x1xf32> to vector<32x128xf32>
    %186 = arith.addf %184, %185 : vector<32x128xf32>
    %cst_87 = arith.constant 0.000000e+00 : f32
    %187 = vector.broadcast %cst_87 : f32 to vector<32x128xf32>
    %188 = arith.maximumf %186, %187 : vector<32x128xf32>
    %189 = arith.maximumf %175, %188 : vector<32x128xf32>
    %c13 = arith.constant 13 : index
    %c0_88 = arith.constant 0 : index
    %c0_89 = arith.constant 0 : index
    %190 = vector.load %arg2[%c13, %c0_88, %c0_89] : memref<16x7x128xbf16, #tpu.memory_space<vmem>>, vector<1x7x128xbf16>
    %191 = vector.shape_cast %190 : vector<1x7x128xbf16> to vector<7x128xbf16>
    %cst_90 = arith.constant dense<0.000000e+00> : vector<16x128xf32>
    %192 = tpu.matmul %3, %191, %cst_90 {dimension_numbers = #tpu.dot_dimension_numbers<[1], [0], [0], [1], [0, 0, 1, 1], [], []>} : vector<16x7xbf16>, vector<7x128xbf16>, vector<16x128xf32> -> vector<16x128xf32>
    %193 = vector.broadcast %5 : vector<16x1xf32> to vector<16x128xf32>
    %194 = arith.addf %192, %193 : vector<16x128xf32>
    %cst_91 = arith.constant 0.000000e+00 : f32
    %195 = vector.broadcast %cst_91 : f32 to vector<16x128xf32>
    %196 = arith.maximumf %194, %195 : vector<16x128xf32>
    %197 = arith.truncf %196 : vector<16x128xf32> to vector<16x128xbf16>
    %cst_92 = arith.constant dense<0.000000e+00> : vector<32x128xf32>
    %198 = tpu.matmul %4, %197, %cst_92 {dimension_numbers = #tpu.dot_dimension_numbers<[1], [0], [0], [1], [0, 0, 1, 1], [], []>} : vector<32x16xbf16>, vector<16x128xbf16>, vector<32x128xf32> -> vector<32x128xf32>
    %199 = vector.broadcast %6 : vector<32x1xf32> to vector<32x128xf32>
    %200 = arith.addf %198, %199 : vector<32x128xf32>
    %cst_93 = arith.constant 0.000000e+00 : f32
    %201 = vector.broadcast %cst_93 : f32 to vector<32x128xf32>
    %202 = arith.maximumf %200, %201 : vector<32x128xf32>
    %203 = arith.maximumf %189, %202 : vector<32x128xf32>
    %c14 = arith.constant 14 : index
    %c0_94 = arith.constant 0 : index
    %c0_95 = arith.constant 0 : index
    %204 = vector.load %arg2[%c14, %c0_94, %c0_95] : memref<16x7x128xbf16, #tpu.memory_space<vmem>>, vector<1x7x128xbf16>
    %205 = vector.shape_cast %204 : vector<1x7x128xbf16> to vector<7x128xbf16>
    %cst_96 = arith.constant dense<0.000000e+00> : vector<16x128xf32>
    %206 = tpu.matmul %3, %205, %cst_96 {dimension_numbers = #tpu.dot_dimension_numbers<[1], [0], [0], [1], [0, 0, 1, 1], [], []>} : vector<16x7xbf16>, vector<7x128xbf16>, vector<16x128xf32> -> vector<16x128xf32>
    %207 = vector.broadcast %5 : vector<16x1xf32> to vector<16x128xf32>
    %208 = arith.addf %206, %207 : vector<16x128xf32>
    %cst_97 = arith.constant 0.000000e+00 : f32
    %209 = vector.broadcast %cst_97 : f32 to vector<16x128xf32>
    %210 = arith.maximumf %208, %209 : vector<16x128xf32>
    %211 = arith.truncf %210 : vector<16x128xf32> to vector<16x128xbf16>
    %cst_98 = arith.constant dense<0.000000e+00> : vector<32x128xf32>
    %212 = tpu.matmul %4, %211, %cst_98 {dimension_numbers = #tpu.dot_dimension_numbers<[1], [0], [0], [1], [0, 0, 1, 1], [], []>} : vector<32x16xbf16>, vector<16x128xbf16>, vector<32x128xf32> -> vector<32x128xf32>
    %213 = vector.broadcast %6 : vector<32x1xf32> to vector<32x128xf32>
    %214 = arith.addf %212, %213 : vector<32x128xf32>
    %cst_99 = arith.constant 0.000000e+00 : f32
    %215 = vector.broadcast %cst_99 : f32 to vector<32x128xf32>
    %216 = arith.maximumf %214, %215 : vector<32x128xf32>
    %217 = arith.maximumf %203, %216 : vector<32x128xf32>
    %c15 = arith.constant 15 : index
    %c0_100 = arith.constant 0 : index
    %c0_101 = arith.constant 0 : index
    %218 = vector.load %arg2[%c15, %c0_100, %c0_101] : memref<16x7x128xbf16, #tpu.memory_space<vmem>>, vector<1x7x128xbf16>
    %219 = vector.shape_cast %218 : vector<1x7x128xbf16> to vector<7x128xbf16>
    %cst_102 = arith.constant dense<0.000000e+00> : vector<16x128xf32>
    %220 = tpu.matmul %3, %219, %cst_102 {dimension_numbers = #tpu.dot_dimension_numbers<[1], [0], [0], [1], [0, 0, 1, 1], [], []>} : vector<16x7xbf16>, vector<7x128xbf16>, vector<16x128xf32> -> vector<16x128xf32>
    %221 = vector.broadcast %5 : vector<16x1xf32> to vector<16x128xf32>
    %222 = arith.addf %220, %221 : vector<16x128xf32>
    %cst_103 = arith.constant 0.000000e+00 : f32
    %223 = vector.broadcast %cst_103 : f32 to vector<16x128xf32>
    %224 = arith.maximumf %222, %223 : vector<16x128xf32>
    %225 = arith.truncf %224 : vector<16x128xf32> to vector<16x128xbf16>
    %cst_104 = arith.constant dense<0.000000e+00> : vector<32x128xf32>
    %226 = tpu.matmul %4, %225, %cst_104 {dimension_numbers = #tpu.dot_dimension_numbers<[1], [0], [0], [1], [0, 0, 1, 1], [], []>} : vector<32x16xbf16>, vector<16x128xbf16>, vector<32x128xf32> -> vector<32x128xf32>
    %227 = vector.broadcast %6 : vector<32x1xf32> to vector<32x128xf32>
    %228 = arith.addf %226, %227 : vector<32x128xf32>
    %cst_105 = arith.constant 0.000000e+00 : f32
    %229 = vector.broadcast %cst_105 : f32 to vector<32x128xf32>
    %230 = arith.maximumf %228, %229 : vector<32x128xf32>
    %231 = arith.maximumf %217, %230 : vector<32x128xf32>
    %c0_106 = arith.constant 0 : index
    %c0_107 = arith.constant 0 : index
    %232 = vector.load %arg7[%c0_106, %c0_107] : memref<32x128xf32, #tpu.memory_space<vmem>>, vector<32x128xf32>
    tpu.vector_store %arg7[%c0_106, %c0_107], %231 {strides = array<i32>} : memref<32x128xf32, #tpu.memory_space<vmem>>, vector<32x128xf32>,
    return
  }
  func.func @transform_0(%arg0: i32, %arg1: i32) -> (i32, i32, i32) {
    %c0_i32 = arith.constant 0 : i32
    %c0_i32_0 = arith.constant 0 : i32
    return %arg1, %c0_i32, %arg0 : i32, i32, i32
  }
  func.func @transform_1(%arg0: i32, %arg1: i32) -> (i32, i32) {
    %c0_i32 = arith.constant 0 : i32
    %c0_i32_0 = arith.constant 0 : i32
    %c0_i32_1 = arith.constant 0 : i32
    return %c0_i32, %c0_i32_0 : i32, i32
  }
  func.func @transform_2(%arg0: i32, %arg1: i32) -> (i32, i32) {
    %c0_i32 = arith.constant 0 : i32
    %c0_i32_0 = arith.constant 0 : i32
    %c0_i32_1 = arith.constant 0 : i32
    return %c0_i32, %c0_i32_0 : i32, i32
  }
  func.func @transform_3(%arg0: i32, %arg1: i32) -> (i32, i32) {
    %c0_i32 = arith.constant 0 : i32
    %c0_i32_0 = arith.constant 0 : i32
    %c0_i32_1 = arith.constant 0 : i32
    return %c0_i32, %c0_i32_0 : i32, i32
  }
  func.func @transform_4(%arg0: i32, %arg1: i32) -> (i32, i32) {
    %c0_i32 = arith.constant 0 : i32
    %c0_i32_0 = arith.constant 0 : i32
    %c0_i32_1 = arith.constant 0 : i32
    return %c0_i32, %c0_i32_0 : i32, i32
  }
  func.func @transform_5(%arg0: i32, %arg1: i32) -> (i32, i32) {
    %c0_i32 = arith.constant 0 : i32
    %c0_i32_0 = arith.constant 0 : i32
    return %c0_i32, %arg0 : i32, i32
  }
}

</mosaic_0001>

<bundles_post_ra>
// kernel: custom-call.12
= control target key start
LH: loop header
LB: loop body
LE: loop exit
PB: predicated region body
PF: predicated region fallthrough
CT: control target
= control target key end

     0   :  { %s6_s0 = inlined_call_operand.vmem [shape: f32[2,64], index: 0, kind: output, shape index: {}]  }

// kernel: _lambda_.2
= control target key start
LH: loop header
LB: loop body
LE: loop exit
PB: predicated region body
PF: predicated region fallthrough
CT: control target
= control target key end

     0   :  { %vm65_vm0 = vcmask 1042432   ;;  %vm66_vm1 = vcmask 1043456   ;;  %v1140_v0 = vmov 0.0   ;;  %v1141_v2 = vmov 65535   ;;  %s1365_s0 = inlined_call_operand.vmem [shape: bf16[8,7,128], index: 0, kind: input, shape index: {}]   ;;  %s1366_s1 = inlined_call_operand.vmem [shape: bf16[16,7], index: 1, kind: input, shape index: {}]   ;;  %s1367_s2 = inlined_call_operand.vmem [shape: f32[16,1], index: 2, kind: input, shape index: {}]   ;;  %s1368_s4 = inlined_call_operand.vmem [shape: f32[32,1], index: 4, kind: input, shape index: {}]   ;;  %s1369_s3 = inlined_call_operand.vmem [shape: bf16[32,16], index: 3, kind: input, shape index: {}]   ;;  %s1370_s5 = inlined_call_operand.vmem [shape: f32[32,128], index: 5, kind: output, shape index: {}]  }
   0x1   :  { %1034 = vmatprep.subr.bf16.mxu0 %v1140_v0  ;;  %v45_v1 = vld [vmem:[%s1365_s0] sm:$0xf]  ;;  %v67_v3 = vsel %vm65_vm0, 4294967295, %v1141_v2  ;;  %vm1142_vm2 = vmmov 0   ;;  %v966_v6 = vld [vmem:[%s1365_s0 + $0x4] sm:$0xf] }
   0x2   :  { %v68_v4 = vsel %vm66_vm1, %v67_v3, 0  ;;  %1036 = vmatprep.mubr.msk.bf16.mxu0 %vm1142_vm2, %v1140_v0  ;;  %v1143_v7 = vmov 0   ;;  %v1137_v8 = vld [vmem:[%s1366_s1] sm:$0xff]   ;;  %vm61_vm3 = vcmask 56320   ;;  %v36_v11 = vld [vmem:[%s1367_s2 + $0x8] sm:$0xff]  ;;  %v39_v13 = vld [vmem:[%s1368_s4 + $0x10] sm:$0xff] }
   0x3   :  { %v70_v5 = vand.u32 %v68_v4, %v45_v1  ;;  %1135 = vset.pattern.permute.xlu0 %v1143_v7  ;;  %1136 = vset.pattern.permute.xlu1 %v1143_v7  ;;  %v213_v9 = vand.u32 %v966_v6, %v68_v4  ;;  %v35_v10 = vld [vmem:[%s1367_s2] sm:$0xff]  ;;  %v970_v12 = vld [vmem:[%s1365_s0 + $0x8] sm:$0xf]  ;;  %v974_v15 = vld [vmem:[%s1365_s0 + $0xc] sm:$0xf]  ;;  %vm146_vm4 = vcmask 130048  }
   0x4   :  { %48 = vperm.xlu0 %1135, %v35_v10   ;;  %v319_v14 = vand.u32 %v970_v12, %v68_v4  ;;  %v425_v16 = vand.u32 %v974_v15, %v68_v4  ;;  %v978_v17 = vld [vmem:[%s1365_s0 + $0x10] sm:$0xf]  ;;  %v982_v19 = vld [vmem:[%s1365_s0 + $0x14] sm:$0xf]  ;;  %v986_v21 = vld [vmem:[%s1365_s0 + $0x18] sm:$0xf] }
   0x5   :  { %1035 = vmatpush3.bf16.msra.mxu0 %v70_v5  ;;  %v531_v18 = vand.u32 %v978_v17, %v68_v4  ;;  %v637_v20 = vand.u32 %v982_v19, %v68_v4  ;;  %v743_v22 = vand.u32 %v986_v21, %v68_v4  ;;  %v990_v23 = vld [vmem:[%s1365_s0 + $0x1c] sm:$0xf]  ;;  %v1245_v25 = vld [vmem:[%s1369_s3] sm:$0xff]   ;;  %v38_v27 = vld [vmem:[%s1368_s4 + $0x8] sm:$0xff] }
   0x6   :  { %1046 = vmatprep.subr.bf16.mxu0 %v1140_v0  ;;  %v849_v24 = vand.u32 %v990_v23, %v68_v4  ;;  %1042 = vmatprep.mubr.msk.bf16.mxu1 %vm146_vm4, %v1245_v25  ;;  %v37_v26 = vld [vmem:[%s1368_s4] sm:$0xff]  ;;  %v40_v28 = vld [vmem:[%s1368_s4 + $0x18] sm:$0xff]  ;;  %v1268_v43 = vld [vmem:[%s1369_s3 + $0x8] sm:$0xff]  }
   0x7   :  { %118 = vperm.xlu1 %1136, %v37_v26  }
   0x8   :  { %1037 = vmatmul.mubr.msk.bf16.vlgmr.msra.gmra.mxu0 %vm61_vm3, %v1137_v8  ;;  %53 = vperm.xlu0 %1135, %v36_v11  }
   0x9   :  { %1047 = vmatpush3.bf16.msra.mxu0 %v213_v9  ;;  %1048 = vmatprep.mubr.msk.bf16.mxu0 %vm1142_vm2, %v1140_v0 }
   0xa   :  { %1058 = vmatprep.subr.bf16.mxu0 %v1140_v0 }
   0xb   :  { %123 = vperm.xlu1 %1136, %v38_v27  }
   0xc   :  { %128 = vperm.xlu0 %1135, %v39_v13  }
   0xf   :  { %133 = vperm.xlu1 %1136, %v40_v28  }
  0x10   :  { %1049 = vmatmul.mubr.msk.bf16.vlgmr.msra.gmra.mxu0 %vm61_vm3, %v1137_v8 }
  0x11   :  { %1059 = vmatpush3.bf16.msra.mxu0 %v319_v14  ;;  %1060 = vmatprep.mubr.msk.bf16.mxu0 %vm1142_vm2, %v1140_v0 }
  0x12   :  { %1070 = vmatprep.subr.bf16.mxu0 %v1140_v0 }
  0x18   :  { %1061 = vmatmul.mubr.msk.bf16.vlgmr.msra.gmra.mxu0 %vm61_vm3, %v1137_v8 }
  0x19   :  { %1071 = vmatpush3.bf16.msra.mxu0 %v425_v16  ;;  %1072 = vmatprep.mubr.msk.bf16.mxu0 %vm1142_vm2, %v1140_v0 }
  0x1a   :  { %1082 = vmatprep.subr.bf16.mxu0 %v1140_v0 }
  0x20   :  { %1073 = vmatmul.mubr.msk.bf16.vlgmr.msra.gmra.mxu0 %vm61_vm3, %v1137_v8 }
  0x21   :  { %1083 = vmatpush3.bf16.msra.mxu0 %v531_v18  ;;  %1084 = vmatprep.mubr.msk.bf16.mxu0 %vm1142_vm2, %v1140_v0 }
  0x22   :  { %1094 = vmatprep.subr.bf16.mxu0 %v1140_v0 }
  0x28   :  { %1085 = vmatmul.mubr.msk.bf16.vlgmr.msra.gmra.mxu0 %vm61_vm3, %v1137_v8 }
  0x29   :  { %1095 = vmatpush3.bf16.msra.mxu0 %v637_v20  ;;  %1096 = vmatprep.mubr.msk.bf16.mxu0 %vm1142_vm2, %v1140_v0 }
  0x2a   :  { %1106 = vmatprep.subr.bf16.mxu0 %v1140_v0 }
  0x30   :  { %1097 = vmatmul.mubr.msk.bf16.vlgmr.msra.gmra.mxu0 %vm61_vm3, %v1137_v8 }
  0x31   :  { %1107 = vmatpush3.bf16.msra.mxu0 %v743_v22  ;;  %1108 = vmatprep.mubr.msk.bf16.mxu0 %vm1142_vm2, %v1140_v0 }
  0x32   :  { %1118 = vmatprep.subr.bf16.mxu0 %v1140_v0 }
  0x38   :  { %1109 = vmatmul.mubr.msk.bf16.vlgmr.msra.gmra.mxu0 %vm61_vm3, %v1137_v8 }
  0x39   :  { %1119 = vmatpush3.bf16.msra.mxu0 %v849_v24  ;;  %1120 = vmatprep.mubr.msk.bf16.mxu0 %vm1142_vm2, %v1140_v0 }
  0x40   :  { %1121 = vmatmul.mubr.msk.bf16.vlgmr.msra.gmra.mxu0 %vm61_vm3, %v1137_v8 }
  0x7f   :  { %v1258_v29 = vpop.permute.xlu0 %48 }
  0x83   :  { %v1261_v33 = vpop.permute.xlu0 %53 }
  0xc8   :  { %v106_v30 = vpop.f32.mrf.mxu0 }
  0xc9   :  { %v107_v32 = vadd.f32 %v106_v30, %v1258_v29 }
  0xca   :  { %v1038_v31 = vpop.f32.mrf.mxu0 }
  0xcb   :  { %v113_v37 = vmax.f32 %v107_v32, 0.0 }
  0xcc   :  { %v109_v34 = vpop.f32.mrf.mxu0 }
  0xcd   :  { %v110_v35 = vadd.f32 %v109_v34, %v1261_v33 }
  0xce   :  { %v1039_v36 = vpop.f32.mrf.mxu0 }
  0xcf   :  { %v114_v38 = vmax.f32 %v110_v35, 0.0 }
  0xd0   :  { %v249_v39 = vpop.f32.mrf.mxu0 }
  0xd1   :  { %v115_v40 = vpack.c.bf16 %v114_v38, %v113_v37  ;;  %v250_v42 = vadd.f32 %v249_v39, %v1258_v29 }
  0xd2   :  { %v1050_v41 = vpop.f32.mrf.mxu0 }
  0xd3   :  { %1040 = vmatprep.subr.bf16.mxu1 %v115_v40  ;;  %v256_v47 = vmax.f32 %v250_v42, 0.0 }
  0xd4   :  { %1041 = vmatpush3.bf16.msra.mxu1 %v115_v40  ;;  %v252_v44 = vpop.f32.mrf.mxu0 }
  0xd5   :  { %v253_v45 = vadd.f32 %v252_v44, %v1261_v33 }
  0xd6   :  { %v1051_v46 = vpop.f32.mrf.mxu0 }
  0xd7   :  { %v257_v48 = vmax.f32 %v253_v45, 0.0  ;;  %1043 = vmatmul.mubr.msk.bf16.vlgmr.msra.gmra.mxu1 %vm146_vm4, %v1268_v43 }
  0xd8   :  { %v355_v49 = vpop.f32.mrf.mxu0  ;;  %1054 = vmatprep.mubr.msk.bf16.mxu1 %vm146_vm4, %v1245_v25 }
  0xd9   :  { %v258_v50 = vpack.c.bf16 %v257_v48, %v256_v47  ;;  %v356_v52 = vadd.f32 %v355_v49, %v1258_v29 }
  0xda   :  { %v1062_v51 = vpop.f32.mrf.mxu0 }
  0xdb   :  { %1052 = vmatprep.subr.bf16.mxu1 %v258_v50  ;;  %v362_v56 = vmax.f32 %v356_v52, 0.0 }
  0xdc   :  { %1053 = vmatpush3.bf16.msra.mxu1 %v258_v50  ;;  %v358_v53 = vpop.f32.mrf.mxu0 }
  0xdd   :  { %v359_v54 = vadd.f32 %v358_v53, %v1261_v33 }
  0xde   :  { %v1063_v55 = vpop.f32.mrf.mxu0 }
  0xdf   :  { %v363_v57 = vmax.f32 %v359_v54, 0.0  ;;  %1055 = vmatmul.mubr.msk.bf16.vlgmr.msra.gmra.mxu1 %vm146_vm4, %v1268_v43  ;;  %v1313_v54 = vpop.permute.xlu1 %118 }
  0xe0   :  { %v461_v58 = vpop.f32.mrf.mxu0  ;;  %1066 = vmatprep.mubr.msk.bf16.mxu1 %vm146_vm4, %v1245_v25 }
  0xe1   :  { %v364_v59 = vpack.c.bf16 %v363_v57, %v362_v56  ;;  %v462_v61 = vadd.f32 %v461_v58, %v1258_v29 }
  0xe2   :  { %v1074_v60 = vpop.f32.mrf.mxu0 }
  0xe3   :  { %1064 = vmatprep.subr.bf16.mxu1 %v364_v59  ;;  %v468_v1 = vmax.f32 %v462_v61, 0.0  ;;  %v1315_v57 = vpop.permute.xlu1 %123  ;;  %v1317_v60 = vpop.permute.xlu0 %128 }
  0xe4   :  { %1065 = vmatpush3.bf16.msra.mxu1 %v364_v59  ;;  %v464_v62 = vpop.f32.mrf.mxu0 }
  0xe5   :  { %v465_v63 = vadd.f32 %v464_v62, %v1261_v33 }
  0xe6   :  { %v1075_v0 = vpop.f32.mrf.mxu0 }
  0xe7   :  { %v469_v2 = vmax.f32 %v465_v63, 0.0  ;;  %1067 = vmatmul.mubr.msk.bf16.vlgmr.msra.gmra.mxu1 %vm146_vm4, %v1268_v43  ;;  %v1319_v61 = vpop.permute.xlu1 %133 }
  0xe8   :  { %v567_v3 = vpop.f32.mrf.mxu0  ;;  %1078 = vmatprep.mubr.msk.bf16.mxu1 %vm146_vm4, %v1245_v25 }
  0xe9   :  { %v470_v4 = vpack.c.bf16 %v469_v2, %v468_v1  ;;  %v568_v6 = vadd.f32 %v567_v3, %v1258_v29 }
  0xea   :  { %v1086_v5 = vpop.f32.mrf.mxu0 }
  0xeb   :  { %1076 = vmatprep.subr.bf16.mxu1 %v470_v4  ;;  %v574_v10 = vmax.f32 %v568_v6, 0.0 }
  0xec   :  { %1077 = vmatpush3.bf16.msra.mxu1 %v470_v4  ;;  %v570_v7 = vpop.f32.mrf.mxu0 }
  0xed   :  { %v571_v8 = vadd.f32 %v570_v7, %v1261_v33 }
  0xee   :  { %v1087_v9 = vpop.f32.mrf.mxu0 }
  0xef   :  { %v575_v11 = vmax.f32 %v571_v8, 0.0  ;;  %1079 = vmatmul.mubr.msk.bf16.vlgmr.msra.gmra.mxu1 %vm146_vm4, %v1268_v43 }
  0xf0   :  { %v673_v12 = vpop.f32.mrf.mxu0  ;;  %1090 = vmatprep.mubr.msk.bf16.mxu1 %vm146_vm4, %v1245_v25 }
  0xf1   :  { %v576_v13 = vpack.c.bf16 %v575_v11, %v574_v10  ;;  %v674_v15 = vadd.f32 %v673_v12, %v1258_v29 }
  0xf2   :  { %v1098_v14 = vpop.f32.mrf.mxu0 }
  0xf3   :  { %1088 = vmatprep.subr.bf16.mxu1 %v576_v13  ;;  %v680_v19 = vmax.f32 %v674_v15, 0.0 }
  0xf4   :  { %1089 = vmatpush3.bf16.msra.mxu1 %v576_v13  ;;  %v676_v16 = vpop.f32.mrf.mxu0 }
  0xf5   :  { %v677_v17 = vadd.f32 %v676_v16, %v1261_v33 }
  0xf6   :  { %v1099_v18 = vpop.f32.mrf.mxu0 }
  0xf7   :  { %v681_v20 = vmax.f32 %v677_v17, 0.0  ;;  %1091 = vmatmul.mubr.msk.bf16.vlgmr.msra.gmra.mxu1 %vm146_vm4, %v1268_v43 }
  0xf8   :  { %v779_v21 = vpop.f32.mrf.mxu0  ;;  %1102 = vmatprep.mubr.msk.bf16.mxu1 %vm146_vm4, %v1245_v25 }
  0xf9   :  { %v682_v22 = vpack.c.bf16 %v681_v20, %v680_v19  ;;  %v780_v24 = vadd.f32 %v779_v21, %v1258_v29 }
  0xfa   :  { %v1110_v23 = vpop.f32.mrf.mxu0 }
  0xfb   :  { %1100 = vmatprep.subr.bf16.mxu1 %v682_v22  ;;  %v786_v30 = vmax.f32 %v780_v24, 0.0 }
  0xfc   :  { %1101 = vmatpush3.bf16.msra.mxu1 %v682_v22  ;;  %v782_v26 = vpop.f32.mrf.mxu0 }
  0xfd   :  { %v783_v27 = vadd.f32 %v782_v26, %v1261_v33 }
  0xfe   :  { %v1111_v28 = vpop.f32.mrf.mxu0 }
  0xff   :  { %v787_v31 = vmax.f32 %v783_v27, 0.0  ;;  %1103 = vmatmul.mubr.msk.bf16.vlgmr.msra.gmra.mxu1 %vm146_vm4, %v1268_v43 }
 0x100   :  { %v885_v32 = vpop.f32.mrf.mxu0  ;;  %1114 = vmatprep.mubr.msk.bf16.mxu1 %vm146_vm4, %v1245_v25 }
 0x101   :  { %v788_v34 = vpack.c.bf16 %v787_v31, %v786_v30  ;;  %v886_v36 = vadd.f32 %v885_v32, %v1258_v29 }
 0x102   :  { %v1122_v35 = vpop.f32.mrf.mxu0 }
 0x103   :  { %1112 = vmatprep.subr.bf16.mxu1 %v788_v34  ;;  %v892_v40 = vmax.f32 %v886_v36, 0.0 }
 0x104   :  { %1113 = vmatpush3.bf16.msra.mxu1 %v788_v34  ;;  %v888_v37 = vpop.f32.mrf.mxu0 }
 0x105   :  { %v889_v38 = vadd.f32 %v888_v37, %v1261_v33 }
 0x106   :  { %v1123_v39 = vpop.f32.mrf.mxu0 }
 0x107   :  { %v893_v41 = vmax.f32 %v889_v38, 0.0  ;;  %1115 = vmatmul.mubr.msk.bf16.vlgmr.msra.gmra.mxu1 %vm146_vm4, %v1268_v43 }
 0x108   :  { %1126 = vmatprep.mubr.msk.bf16.mxu1 %vm146_vm4, %v1245_v25 }
 0x109   :  { %v894_v42 = vpack.c.bf16 %v893_v41, %v892_v40 }
 0x10b   :  { %1124 = vmatprep.subr.bf16.mxu1 %v894_v42 }
 0x10c   :  { %1125 = vmatpush3.bf16.msra.mxu1 %v894_v42 }
 0x10f   :  { %1127 = vmatmul.mubr.msk.bf16.vlgmr.msra.gmra.mxu1 %vm146_vm4, %v1268_v43 }
 0x197   :  { %v1044_v29 = vpop.f32.mrf.mxu1 }
 0x198   :  { %v196_v62 = vadd.f32 %v1044_v29, %v1317_v60 }
 0x199   :  { %v187_v44 = vpop.f32.mrf.mxu1 }
 0x19a   :  { %v188_v0 = vadd.f32 %v187_v44, %v1313_v54  ;;  %v204_v6 = vmax.f32 %v196_v62, 0.0 }
 0x19b   :  { %v1045_v45 = vpop.f32.mrf.mxu1 }
 0x19c   :  { %v199_v3 = vadd.f32 %v1045_v45, %v1319_v61  ;;  %v202_v11 = vmax.f32 %v188_v0, 0.0 }
 0x19d   :  { %v190_v46 = vpop.f32.mrf.mxu1 }
 0x19e   :  { %v191_v1 = vadd.f32 %v190_v46, %v1315_v57  ;;  %v205_v14 = vmax.f32 %v199_v3, 0.0 }
 0x19f   :  { %v1056_v33 = vpop.f32.mrf.mxu1 }
 0x1a0   :  { %v302_v2 = vadd.f32 %v1056_v33, %v1317_v60  ;;  %v203_v12 = vmax.f32 %v191_v1, 0.0 }
 0x1a1   :  { %v293_v47 = vpop.f32.mrf.mxu1 }
 0x1a2   :  { %v294_v5 = vadd.f32 %v293_v47, %v1313_v54  ;;  %v310_v13 = vmax.f32 %v302_v2, 0.0 }
 0x1a3   :  { %v1057_v48 = vpop.f32.mrf.mxu1 }
 0x1a4   :  { %v305_v7 = vadd.f32 %v1057_v48, %v1319_v61  ;;  %v308_v17 = vmax.f32 %v294_v5, 0.0  ;;  %v314_v27 = vmax.f32 %v204_v6, %v310_v13 }
 0x1a5   :  { %v296_v49 = vpop.f32.mrf.mxu1 }
 0x1a6   :  { %v297_v8 = vadd.f32 %v296_v49, %v1315_v57  ;;  %v311_v19 = vmax.f32 %v305_v7, 0.0  ;;  %v312_v31 = vmax.f32 %v202_v11, %v308_v17 }
 0x1a7   :  { %v1068_v50 = vpop.f32.mrf.mxu1 }
 0x1a8   :  { %v408_v9 = vadd.f32 %v1068_v50, %v1317_v60  ;;  %v309_v20 = vmax.f32 %v297_v8, 0.0  ;;  %v315_v36 = vmax.f32 %v205_v14, %v311_v19 }
 0x1a9   :  { %v399_v51 = vpop.f32.mrf.mxu1 }
 0x1aa   :  { %v400_v15 = vadd.f32 %v399_v51, %v1313_v54  ;;  %v416_v21 = vmax.f32 %v408_v9, 0.0  ;;  %v313_v37 = vmax.f32 %v203_v12, %v309_v20 }
 0x1ab   :  { %v1069_v52 = vpop.f32.mrf.mxu1 }
 0x1ac   :  { %v411_v18 = vadd.f32 %v1069_v52, %v1319_v61  ;;  %v414_v28 = vmax.f32 %v400_v15, 0.0  ;;  %v420_v38 = vmax.f32 %v314_v27, %v416_v21 }
 0x1ad   :  { %v402_v53 = vpop.f32.mrf.mxu1 }
 0x1ae   :  { %v403_v23 = vadd.f32 %v402_v53, %v1315_v57  ;;  %v417_v32 = vmax.f32 %v411_v18, 0.0  ;;  %v418_v45 = vmax.f32 %v312_v31, %v414_v28 }
 0x1af   :  { %v1080_v25 = vpop.f32.mrf.mxu1 }
 0x1b0   :  { %v514_v24 = vadd.f32 %v1080_v25, %v1317_v60  ;;  %v415_v41 = vmax.f32 %v403_v23, 0.0  ;;  %v421_v49 = vmax.f32 %v315_v36, %v417_v32 }
 0x1b1   :  { %v505_v55 = vpop.f32.mrf.mxu1 }
 0x1b2   :  { %v506_v26 = vadd.f32 %v505_v55, %v1313_v54  ;;  %v522_v42 = vmax.f32 %v514_v24, 0.0 }
 0x1b3   :  { %v1081_v56 = vpop.f32.mrf.mxu1 }
 0x1b4   :  { %v517_v34 = vadd.f32 %v1081_v56, %v1319_v61  ;;  %v520_v29 = vmax.f32 %v506_v26, 0.0 }
 0x1b5   :  { %v508_v43 = vpop.f32.mrf.mxu1 }
 0x1b6   :  { %v509_v46 = vadd.f32 %v508_v43, %v1315_v57  ;;  %v523_v50 = vmax.f32 %v517_v34, 0.0  ;;  %v526_v43 = vmax.f32 %v420_v38, %v522_v42  ;;  %v524_v62 = vmax.f32 %v418_v45, %v520_v29 }
 0x1b7   :  { %v1092_v58 = vpop.f32.mrf.mxu1 }
 0x1b8   :  { %v620_v35 = vadd.f32 %v1092_v58, %v1317_v60  ;;  %v521_v0 = vmax.f32 %v509_v46, 0.0  ;;  %v527_v6 = vmax.f32 %v421_v49, %v523_v50 }
 0x1b9   :  { %v611_v59 = vpop.f32.mrf.mxu1 }
 0x1ba   :  { %v612_v39 = vadd.f32 %v611_v59, %v1313_v54  ;;  %v628_v51 = vmax.f32 %v620_v35, 0.0  ;;  %v419_v59 = vmax.f32 %v313_v37, %v415_v41 }
 0x1bb   :  { %v1093_v63 = vpop.f32.mrf.mxu1 }
 0x1bc   :  { %v623_v33 = vadd.f32 %v1093_v63, %v1319_v61  ;;  %v626_v53 = vmax.f32 %v612_v39, 0.0  ;;  %v632_v7 = vmax.f32 %v526_v43, %v628_v51  ;;  %v525_v17 = vmax.f32 %v419_v59, %v521_v0 }
 0x1bd   :  { %v614_v4 = vpop.f32.mrf.mxu1 }
 0x1be   :  { %v615_v25 = vadd.f32 %v614_v4, %v1315_v57  ;;  %v629_v1 = vmax.f32 %v623_v33, 0.0  ;;  %v630_v9 = vmax.f32 %v524_v62, %v626_v53 }
 0x1bf   :  { %v1104_v10 = vpop.f32.mrf.mxu1 }
 0x1c0   :  { %v726_v44 = vadd.f32 %v1104_v10, %v1317_v60  ;;  %v627_v10 = vmax.f32 %v615_v25, 0.0  ;;  %v633_v18 = vmax.f32 %v527_v6, %v629_v1 }
 0x1c1   :  { %v717_v16 = vpop.f32.mrf.mxu1 }
 0x1c2   :  { %v718_v47 = vadd.f32 %v717_v16, %v1313_v54  ;;  %v734_v63 = vmax.f32 %v726_v44, 0.0  ;;  %v631_v27 = vmax.f32 %v525_v17, %v627_v10 }
 0x1c3   :  { %v1105_v22 = vpop.f32.mrf.mxu1 }
 0x1c4   :  { %v729_v55 = vadd.f32 %v1105_v22, %v1319_v61  ;;  %v732_v2 = vmax.f32 %v718_v47, 0.0  ;;  %v738_v14 = vmax.f32 %v632_v7, %v734_v63 }
 0x1c5   :  { %v720_v30 = vpop.f32.mrf.mxu1 }
 0x1c6   :  { %v721_v3 = vadd.f32 %v720_v30, %v1315_v57  ;;  %v735_v11 = vmax.f32 %v729_v55, 0.0  ;;  %v736_v19 = vmax.f32 %v630_v9, %v732_v2 }
 0x1c7   :  { %v1116_v40 = vpop.f32.mrf.mxu1 }
 0x1c8   :  { %v832_v52 = vadd.f32 %v1116_v40, %v1317_v60  ;;  %v733_v20 = vmax.f32 %v721_v3, 0.0  ;;  %v739_v28 = vmax.f32 %v633_v18, %v735_v11 }
 0x1c9   :  { %v823_v48 = vpop.f32.mrf.mxu1 }
 0x1ca   :  { %v824_v56 = vadd.f32 %v823_v48, %v1313_v54  ;;  %v840_v8 = vmax.f32 %v832_v52, 0.0 }
 0x1cb   :  { %v1117_v58 = vpop.f32.mrf.mxu1 }
 0x1cc   :  { %v835_v4 = vadd.f32 %v1117_v58, %v1319_v61  ;;  %v838_v12 = vmax.f32 %v824_v56, 0.0  ;;  %v844_v22 = vmax.f32 %v738_v14, %v840_v8 }
 0x1cd   :  { %v826_v5 = vpop.f32.mrf.mxu1 }
 0x1ce   :  { %v827_v15 = vadd.f32 %v826_v5, %v1315_v57  ;;  %v841_v23 = vmax.f32 %v835_v4, 0.0  ;;  %v842_v30 = vmax.f32 %v736_v19, %v838_v12 }
 0x1cf   :  { %v1128_v13 = vpop.f32.mrf.mxu1 }
 0x1d0   :  { %v938_v16 = vadd.f32 %v1128_v13, %v1317_v60  ;;  %v839_v32 = vmax.f32 %v827_v15, 0.0  ;;  %v737_v60 = vmax.f32 %v631_v27, %v733_v20  ;;  %v845_v38 = vmax.f32 %v739_v28, %v841_v23 }
 0x1d1   :  { %v929_v21 = vpop.f32.mrf.mxu1 }
 0x1d2   :  { %v946_v24 = vmax.f32 %v938_v16, 0.0  ;;  %v930_v26 = vadd.f32 %v929_v21, %v1313_v54  ;;  %v843_v41 = vmax.f32 %v737_v60, %v839_v32 }
 0x1d3   :  { %v1129_v31 = vpop.f32.mrf.mxu1 }
 0x1d4   :  { %v950_v34 = vmax.f32 %v844_v22, %v946_v24  ;;  %v944_v35 = vmax.f32 %v930_v26, 0.0  ;;  %v941_v36 = vadd.f32 %v1129_v31, %v1319_v61 }
 0x1d5   :  { %v932_v37 = vpop.f32.mrf.mxu1 }
 0x1d6   :  { %954 = vst [vmem:[%s1370_s5 + $0x10] sm:$0xff] %v950_v34  ;;  %v948_v39 = vmax.f32 %v842_v30, %v944_v35  ;;  %v947_v40 = vmax.f32 %v941_v36, 0.0  ;;  %v933_v54 = vadd.f32 %v932_v37, %v1315_v57 }
 0x1d8   :  { %952 = vst [vmem:[%s1370_s5] sm:$0xff] %v948_v39  ;;  %v951_v42 = vmax.f32 %v845_v38, %v947_v40  ;;  %v945_v29 = vmax.f32 %v933_v54, 0.0 }
 0x1da   :  { %955 = vst [vmem:[%s1370_s5 + $0x18] sm:$0xff] %v951_v42  ;;  %v949_v61 = vmax.f32 %v843_v41, %v945_v29 }
 0x1dc   :  { %953 = vst [vmem:[%s1370_s5 + $0x8] sm:$0xff] %v949_v61 }

// kernel: _lambda_.3
= control target key start
LH: loop header
LB: loop body
LE: loop exit
PB: predicated region body
PF: predicated region fallthrough
CT: control target
= control target key end

     0   :  { %vm65_vm0 = vcmask 1042432   ;;  %vm66_vm1 = vcmask 1043456   ;;  %v2156_v0 = vmov 0.0   ;;  %v2157_v2 = vmov 65535   ;;  %s2613_s0 = inlined_call_operand.vmem [shape: bf16[16,7,128], index: 0, kind: input, shape index: {}]   ;;  %s2614_s1 = inlined_call_operand.vmem [shape: bf16[16,7], index: 1, kind: input, shape index: {}]   ;;  %s2615_s2 = inlined_call_operand.vmem [shape: f32[16,1], index: 2, kind: input, shape index: {}]   ;;  %s2616_s4 = inlined_call_operand.vmem [shape: f32[32,1], index: 4, kind: input, shape index: {}]   ;;  %s2617_s3 = inlined_call_operand.vmem [shape: bf16[32,16], index: 3, kind: input, shape index: {}]   ;;  %s2618_s5 = inlined_call_operand.vmem [shape: f32[32,128], index: 5, kind: output, shape index: {}]  }
   0x1   :  { %1954 = vmatprep.subr.bf16.mxu0 %v2156_v0  ;;  %v45_v1 = vld [vmem:[%s2613_s0] sm:$0xf]  ;;  %v67_v3 = vsel %vm65_vm0, 4294967295, %v2157_v2  ;;  %vm2158_vm2 = vmmov 0   ;;  %v1814_v6 = vld [vmem:[%s2613_s0 + $0x4] sm:$0xf] }
   0x2   :  { %v2194_v4 = vsel %vm66_vm1, %v67_v3, 0  ;;  %1956 = vmatprep.mubr.msk.bf16.mxu0 %vm2158_vm2, %v2156_v0  ;;  %v2159_v7 = vmov 0   ;;  %v2205_v8 = vld [vmem:[%s2614_s1] sm:$0xff]   ;;  %vm61_vm3 = vcmask 56320   ;;  %v36_v11 = vld [vmem:[%s2615_s2 + $0x8] sm:$0xff]  ;;  %v39_v27 = vld [vmem:[%s2616_s4 + $0x10] sm:$0xff] }
   0x3   :  { %v70_v5 = vand.u32 %v2194_v4, %v45_v1  ;;  %2151 = vset.pattern.permute.xlu0 %v2159_v7  ;;  %2152 = vset.pattern.permute.xlu1 %v2159_v7  ;;  %v213_v9 = vand.u32 %v1814_v6, %v2194_v4  ;;  %v35_v10 = vld [vmem:[%s2615_s2] sm:$0xff]  ;;  %v2225_v14 = vld [vmem:[%s2613_s0 + $0x28] sm:$0xf]  ;;  %v2230_v15 = vld [vmem:[%s2613_s0 + $0x2c] sm:$0xf]  ;;  %vm146_vm4 = vcmask 130048  }
   0x4   :  { %48 = vperm.xlu0 %2151, %v35_v10   ;;  %v2218_v12 = vld [vmem:[%s2613_s0 + $0x24] sm:$0xf]  ;;  %v2235_v16 = vld [vmem:[%s2613_s0 + $0x30] sm:$0xf]  ;;  %v1167_v17 = vand.u32 %v2225_v14, %v2194_v4  ;;  %v1273_v18 = vand.u32 %v2230_v15, %v2194_v4  ;;  %v2248_v20 = vld [vmem:[%s2613_s0 + $0x34] sm:$0xf] }
   0x5   :  { %1955 = vmatpush3.bf16.msra.mxu0 %v70_v5  ;;  %v1061_v13 = vand.u32 %v2218_v12, %v2194_v4  ;;  %v1379_v19 = vand.u32 %v2235_v16, %v2194_v4  ;;  %v2253_v21 = vld [vmem:[%s2613_s0 + $0x38] sm:$0xf]  ;;  %v2258_v22 = vld [vmem:[%s2613_s0 + $0x3c] sm:$0xf]  ;;  %v1485_v23 = vand.u32 %v2248_v20, %v2194_v4  ;;  %v1818_v26 = vld [vmem:[%s2613_s0 + $0x8] sm:$0xf] }
   0x6   :  { %1966 = vmatprep.subr.bf16.mxu0 %v2156_v0  ;;  %v1591_v24 = vand.u32 %v2253_v21, %v2194_v4  ;;  %v1697_v25 = vand.u32 %v2258_v22, %v2194_v4  ;;  %v319_v28 = vand.u32 %v1818_v26, %v2194_v4  ;;  %v1822_v29 = vld [vmem:[%s2613_s0 + $0xc] sm:$0xf]  ;;  %v1826_v31 = vld [vmem:[%s2613_s0 + $0x10] sm:$0xf]  ;;  %v1830_v33 = vld [vmem:[%s2613_s0 + $0x14] sm:$0xf] }
   0x7   :  { %v425_v30 = vand.u32 %v1822_v29, %v2194_v4  ;;  %v531_v32 = vand.u32 %v1826_v31, %v2194_v4  ;;  %v637_v34 = vand.u32 %v1830_v33, %v2194_v4  ;;  %v1834_v35 = vld [vmem:[%s2613_s0 + $0x18] sm:$0xf]  ;;  %v1838_v37 = vld [vmem:[%s2613_s0 + $0x1c] sm:$0xf]  ;;  %v1842_v39 = vld [vmem:[%s2613_s0 + $0x20] sm:$0xf] }
   0x8   :  { %1957 = vmatmul.mubr.msk.bf16.vlgmr.msra.gmra.mxu0 %vm61_vm3, %v2205_v8  ;;  %53 = vperm.xlu0 %2151, %v36_v11   ;;  %v743_v36 = vand.u32 %v1834_v35, %v2194_v4  ;;  %v849_v38 = vand.u32 %v1838_v37, %v2194_v4  ;;  %v955_v40 = vand.u32 %v1842_v39, %v2194_v4  ;;  %v2351_v41 = vld [vmem:[%s2617_s3] sm:$0xff]   ;;  %v38_v43 = vld [vmem:[%s2616_s4 + $0x8] sm:$0xff]  ;;  %v40_v44 = vld [vmem:[%s2616_s4 + $0x18] sm:$0xff] }
   0x9   :  { %1967 = vmatpush3.bf16.msra.mxu0 %v213_v9  ;;  %1968 = vmatprep.mubr.msk.bf16.mxu0 %vm2158_vm2, %v2156_v0  ;;  %v37_v42 = vld [vmem:[%s2616_s4] sm:$0xff]  ;;  %v2415_v59 = vld [vmem:[%s2617_s3 + $0x8] sm:$0xff]  }
   0xa   :  { %1978 = vmatprep.subr.bf16.mxu0 %v2156_v0  ;;  %1962 = vmatprep.mubr.msk.bf16.mxu1 %vm146_vm4, %v2351_v41 }
   0xb   :  { %118 = vperm.xlu1 %2152, %v37_v42  }
   0xc   :  { %128 = vperm.xlu0 %2151, %v39_v27  }
   0xf   :  { %123 = vperm.xlu1 %2152, %v38_v43  }
  0x10   :  { %1969 = vmatmul.mubr.msk.bf16.vlgmr.msra.gmra.mxu0 %vm61_vm3, %v2205_v8 }
  0x11   :  { %1979 = vmatpush3.bf16.msra.mxu0 %v319_v28  ;;  %1980 = vmatprep.mubr.msk.bf16.mxu0 %vm2158_vm2, %v2156_v0 }
  0x12   :  { %1990 = vmatprep.subr.bf16.mxu0 %v2156_v0 }
  0x13   :  { %133 = vperm.xlu1 %2152, %v40_v44  }
  0x18   :  { %1981 = vmatmul.mubr.msk.bf16.vlgmr.msra.gmra.mxu0 %vm61_vm3, %v2205_v8 }
  0x19   :  { %1991 = vmatpush3.bf16.msra.mxu0 %v425_v30  ;;  %1992 = vmatprep.mubr.msk.bf16.mxu0 %vm2158_vm2, %v2156_v0 }
  0x1a   :  { %2002 = vmatprep.subr.bf16.mxu0 %v2156_v0 }
  0x20   :  { %1993 = vmatmul.mubr.msk.bf16.vlgmr.msra.gmra.mxu0 %vm61_vm3, %v2205_v8 }
  0x21   :  { %2003 = vmatpush3.bf16.msra.mxu0 %v531_v32  ;;  %2004 = vmatprep.mubr.msk.bf16.mxu0 %vm2158_vm2, %v2156_v0 }
  0x22   :  { %2014 = vmatprep.subr.bf16.mxu0 %v2156_v0 }
  0x28   :  { %2005 = vmatmul.mubr.msk.bf16.vlgmr.msra.gmra.mxu0 %vm61_vm3, %v2205_v8 }
  0x29   :  { %2015 = vmatpush3.bf16.msra.mxu0 %v637_v34  ;;  %2016 = vmatprep.mubr.msk.bf16.mxu0 %vm2158_vm2, %v2156_v0 }
  0x2a   :  { %2026 = vmatprep.subr.bf16.mxu0 %v2156_v0 }
  0x30   :  { %2017 = vmatmul.mubr.msk.bf16.vlgmr.msra.gmra.mxu0 %vm61_vm3, %v2205_v8 }
  0x31   :  { %2027 = vmatpush3.bf16.msra.mxu0 %v743_v36  ;;  %2028 = vmatprep.mubr.msk.bf16.mxu0 %vm2158_vm2, %v2156_v0 }
  0x32   :  { %2038 = vmatprep.subr.bf16.mxu0 %v2156_v0 }
  0x38   :  { %2029 = vmatmul.mubr.msk.bf16.vlgmr.msra.gmra.mxu0 %vm61_vm3, %v2205_v8 }
  0x39   :  { %2039 = vmatpush3.bf16.msra.mxu0 %v849_v38  ;;  %2040 = vmatprep.mubr.msk.bf16.mxu0 %vm2158_vm2, %v2156_v0 }
  0x3a   :  { %2050 = vmatprep.subr.bf16.mxu0 %v2156_v0 }
  0x40   :  { %2041 = vmatmul.mubr.msk.bf16.vlgmr.msra.gmra.mxu0 %vm61_vm3, %v2205_v8 }
  0x41   :  { %2051 = vmatpush3.bf16.msra.mxu0 %v955_v40  ;;  %2052 = vmatprep.mubr.msk.bf16.mxu0 %vm2158_vm2, %v2156_v0 }
  0x42   :  { %2062 = vmatprep.subr.bf16.mxu0 %v2156_v0 }
  0x48   :  { %2053 = vmatmul.mubr.msk.bf16.vlgmr.msra.gmra.mxu0 %vm61_vm3, %v2205_v8 }
  0x49   :  { %2063 = vmatpush3.bf16.msra.mxu0 %v1061_v13  ;;  %2064 = vmatprep.mubr.msk.bf16.mxu0 %vm2158_vm2, %v2156_v0 }
  0x4a   :  { %2074 = vmatprep.subr.bf16.mxu0 %v2156_v0 }
  0x50   :  { %2065 = vmatmul.mubr.msk.bf16.vlgmr.msra.gmra.mxu0 %vm61_vm3, %v2205_v8 }
  0x51   :  { %2075 = vmatpush3.bf16.msra.mxu0 %v1167_v17  ;;  %2076 = vmatprep.mubr.msk.bf16.mxu0 %vm2158_vm2, %v2156_v0 }
  0x52   :  { %2086 = vmatprep.subr.bf16.mxu0 %v2156_v0 }
  0x58   :  { %2077 = vmatmul.mubr.msk.bf16.vlgmr.msra.gmra.mxu0 %vm61_vm3, %v2205_v8 }
  0x59   :  { %2087 = vmatpush3.bf16.msra.mxu0 %v1273_v18  ;;  %2088 = vmatprep.mubr.msk.bf16.mxu0 %vm2158_vm2, %v2156_v0 }
  0x5a   :  { %2098 = vmatprep.subr.bf16.mxu0 %v2156_v0 }
  0x60   :  { %2089 = vmatmul.mubr.msk.bf16.vlgmr.msra.gmra.mxu0 %vm61_vm3, %v2205_v8 }
  0x61   :  { %2099 = vmatpush3.bf16.msra.mxu0 %v1379_v19  ;;  %2100 = vmatprep.mubr.msk.bf16.mxu0 %vm2158_vm2, %v2156_v0 }
  0x62   :  { %2110 = vmatprep.subr.bf16.mxu0 %v2156_v0 }
  0x68   :  { %2101 = vmatmul.mubr.msk.bf16.vlgmr.msra.gmra.mxu0 %vm61_vm3, %v2205_v8 }
  0x69   :  { %2111 = vmatpush3.bf16.msra.mxu0 %v1485_v23  ;;  %2112 = vmatprep.mubr.msk.bf16.mxu0 %vm2158_vm2, %v2156_v0 }
  0x6a   :  { %2122 = vmatprep.subr.bf16.mxu0 %v2156_v0 }
  0x70   :  { %2113 = vmatmul.mubr.msk.bf16.vlgmr.msra.gmra.mxu0 %vm61_vm3, %v2205_v8 }
  0x71   :  { %2123 = vmatpush3.bf16.msra.mxu0 %v1591_v24  ;;  %2124 = vmatprep.mubr.msk.bf16.mxu0 %vm2158_vm2, %v2156_v0 }
  0x72   :  { %2134 = vmatprep.subr.bf16.mxu0 %v2156_v0 }
  0x78   :  { %2125 = vmatmul.mubr.msk.bf16.vlgmr.msra.gmra.mxu0 %vm61_vm3, %v2205_v8 }
  0x79   :  { %2135 = vmatpush3.bf16.msra.mxu0 %v1697_v25  ;;  %2136 = vmatprep.mubr.msk.bf16.mxu0 %vm2158_vm2, %v2156_v0 }
  0x7f   :  { %v2405_v45 = vpop.permute.xlu0 %48 }
  0x80   :  { %2137 = vmatmul.mubr.msk.bf16.vlgmr.msra.gmra.mxu0 %vm61_vm3, %v2205_v8 }
  0x83   :  { %v2408_v49 = vpop.permute.xlu0 %53 }
  0xc8   :  { %v106_v46 = vpop.f32.mrf.mxu0 }
  0xc9   :  { %v107_v48 = vadd.f32 %v106_v46, %v2405_v45 }
  0xca   :  { %v1958_v47 = vpop.f32.mrf.mxu0 }
  0xcb   :  { %v113_v53 = vmax.f32 %v107_v48, 0.0 }
  0xcc   :  { %v109_v50 = vpop.f32.mrf.mxu0 }
  0xcd   :  { %v110_v51 = vadd.f32 %v109_v50, %v2408_v49 }
  0xce   :  { %v1959_v52 = vpop.f32.mrf.mxu0 }
  0xcf   :  { %v114_v54 = vmax.f32 %v110_v51, 0.0 }
  0xd0   :  { %v249_v55 = vpop.f32.mrf.mxu0 }
  0xd1   :  { %v115_v56 = vpack.c.bf16 %v114_v54, %v113_v53  ;;  %v250_v58 = vadd.f32 %v249_v55, %v2405_v45 }
  0xd2   :  { %v1970_v57 = vpop.f32.mrf.mxu0 }
  0xd3   :  { %1960 = vmatprep.subr.bf16.mxu1 %v115_v56  ;;  %v256_v63 = vmax.f32 %v250_v58, 0.0 }
  0xd4   :  { %1961 = vmatpush3.bf16.msra.mxu1 %v115_v56  ;;  %v252_v60 = vpop.f32.mrf.mxu0 }
  0xd5   :  { %v253_v61 = vadd.f32 %v252_v60, %v2408_v49 }
  0xd6   :  { %v1971_v62 = vpop.f32.mrf.mxu0 }
  0xd7   :  { %v257_v0 = vmax.f32 %v253_v61, 0.0  ;;  %1963 = vmatmul.mubr.msk.bf16.vlgmr.msra.gmra.mxu1 %vm146_vm4, %v2415_v59 }
  0xd8   :  { %v355_v1 = vpop.f32.mrf.mxu0  ;;  %1974 = vmatprep.mubr.msk.bf16.mxu1 %vm146_vm4, %v2351_v41 }
  0xd9   :  { %v258_v2 = vpack.c.bf16 %v257_v0, %v256_v63  ;;  %v356_v4 = vadd.f32 %v355_v1, %v2405_v45 }
  0xda   :  { %v1982_v3 = vpop.f32.mrf.mxu0 }
  0xdb   :  { %1972 = vmatprep.subr.bf16.mxu1 %v258_v2  ;;  %v362_v8 = vmax.f32 %v356_v4, 0.0 }
  0xdc   :  { %1973 = vmatpush3.bf16.msra.mxu1 %v258_v2  ;;  %v358_v5 = vpop.f32.mrf.mxu0 }
  0xdd   :  { %v359_v6 = vadd.f32 %v358_v5, %v2408_v49 }
  0xde   :  { %v1983_v7 = vpop.f32.mrf.mxu0 }
  0xdf   :  { %v363_v9 = vmax.f32 %v359_v6, 0.0  ;;  %1975 = vmatmul.mubr.msk.bf16.vlgmr.msra.gmra.mxu1 %vm146_vm4, %v2415_v59 }
  0xe0   :  { %v461_v10 = vpop.f32.mrf.mxu0  ;;  %1986 = vmatprep.mubr.msk.bf16.mxu1 %vm146_vm4, %v2351_v41 }
  0xe1   :  { %v364_v11 = vpack.c.bf16 %v363_v9, %v362_v8  ;;  %v462_v13 = vadd.f32 %v461_v10, %v2405_v45 }
  0xe2   :  { %v1994_v12 = vpop.f32.mrf.mxu0 }
  0xe3   :  { %1984 = vmatprep.subr.bf16.mxu1 %v364_v11  ;;  %v468_v17 = vmax.f32 %v462_v13, 0.0 }
  0xe4   :  { %1985 = vmatpush3.bf16.msra.mxu1 %v364_v11  ;;  %v464_v14 = vpop.f32.mrf.mxu0 }
  0xe5   :  { %v465_v15 = vadd.f32 %v464_v14, %v2408_v49 }
  0xe6   :  { %v1995_v16 = vpop.f32.mrf.mxu0 }
  0xe7   :  { %v469_v18 = vmax.f32 %v465_v15, 0.0  ;;  %1987 = vmatmul.mubr.msk.bf16.vlgmr.msra.gmra.mxu1 %vm146_vm4, %v2415_v59 }
  0xe8   :  { %v567_v19 = vpop.f32.mrf.mxu0  ;;  %1998 = vmatprep.mubr.msk.bf16.mxu1 %vm146_vm4, %v2351_v41 }
  0xe9   :  { %v470_v20 = vpack.c.bf16 %v469_v18, %v468_v17  ;;  %v568_v22 = vadd.f32 %v567_v19, %v2405_v45 }
  0xea   :  { %v2006_v21 = vpop.f32.mrf.mxu0 }
  0xeb   :  { %1996 = vmatprep.subr.bf16.mxu1 %v470_v20  ;;  %v574_v26 = vmax.f32 %v568_v22, 0.0 }
  0xec   :  { %1997 = vmatpush3.bf16.msra.mxu1 %v470_v20  ;;  %v570_v23 = vpop.f32.mrf.mxu0 }
  0xed   :  { %v571_v24 = vadd.f32 %v570_v23, %v2408_v49 }
  0xee   :  { %v2007_v25 = vpop.f32.mrf.mxu0 }
  0xef   :  { %v575_v27 = vmax.f32 %v571_v24, 0.0  ;;  %1999 = vmatmul.mubr.msk.bf16.vlgmr.msra.gmra.mxu1 %vm146_vm4, %v2415_v59 }
  0xf0   :  { %v673_v28 = vpop.f32.mrf.mxu0  ;;  %2010 = vmatprep.mubr.msk.bf16.mxu1 %vm146_vm4, %v2351_v41 }
  0xf1   :  { %v576_v29 = vpack.c.bf16 %v575_v27, %v574_v26  ;;  %v674_v31 = vadd.f32 %v673_v28, %v2405_v45 }
  0xf2   :  { %v2018_v30 = vpop.f32.mrf.mxu0 }
  0xf3   :  { %2008 = vmatprep.subr.bf16.mxu1 %v576_v29  ;;  %v680_v35 = vmax.f32 %v674_v31, 0.0 }
  0xf4   :  { %2009 = vmatpush3.bf16.msra.mxu1 %v576_v29  ;;  %v676_v32 = vpop.f32.mrf.mxu0 }
  0xf5   :  { %v677_v33 = vadd.f32 %v676_v32, %v2408_v49 }
  0xf6   :  { %v2019_v34 = vpop.f32.mrf.mxu0 }
  0xf7   :  { %v681_v36 = vmax.f32 %v677_v33, 0.0  ;;  %2011 = vmatmul.mubr.msk.bf16.vlgmr.msra.gmra.mxu1 %vm146_vm4, %v2415_v59 }
  0xf8   :  { %v779_v37 = vpop.f32.mrf.mxu0  ;;  %2022 = vmatprep.mubr.msk.bf16.mxu1 %vm146_vm4, %v2351_v41 }
  0xf9   :  { %v682_v38 = vpack.c.bf16 %v681_v36, %v680_v35  ;;  %v780_v40 = vadd.f32 %v779_v37, %v2405_v45 }
  0xfa   :  { %v2030_v39 = vpop.f32.mrf.mxu0 }
  0xfb   :  { %2020 = vmatprep.subr.bf16.mxu1 %v682_v38  ;;  %v786_v46 = vmax.f32 %v780_v40, 0.0 }
  0xfc   :  { %2021 = vmatpush3.bf16.msra.mxu1 %v682_v38  ;;  %v782_v42 = vpop.f32.mrf.mxu0 }
  0xfd   :  { %v783_v43 = vadd.f32 %v782_v42, %v2408_v49 }
  0xfe   :  { %v2031_v44 = vpop.f32.mrf.mxu0 }
  0xff   :  { %v787_v47 = vmax.f32 %v783_v43, 0.0  ;;  %2023 = vmatmul.mubr.msk.bf16.vlgmr.msra.gmra.mxu1 %vm146_vm4, %v2415_v59 }
 0x100   :  { %v885_v48 = vpop.f32.mrf.mxu0  ;;  %2034 = vmatprep.mubr.msk.bf16.mxu1 %vm146_vm4, %v2351_v41 }
 0x101   :  { %v788_v50 = vpack.c.bf16 %v787_v47, %v786_v46  ;;  %v886_v52 = vadd.f32 %v885_v48, %v2405_v45 }
 0x102   :  { %v2042_v51 = vpop.f32.mrf.mxu0 }
 0x103   :  { %2032 = vmatprep.subr.bf16.mxu1 %v788_v50  ;;  %v892_v56 = vmax.f32 %v886_v52, 0.0 }
 0x104   :  { %2033 = vmatpush3.bf16.msra.mxu1 %v788_v50  ;;  %v888_v53 = vpop.f32.mrf.mxu0 }
 0x105   :  { %v889_v54 = vadd.f32 %v888_v53, %v2408_v49 }
 0x106   :  { %v2043_v55 = vpop.f32.mrf.mxu0 }
 0x107   :  { %v893_v57 = vmax.f32 %v889_v54, 0.0  ;;  %2035 = vmatmul.mubr.msk.bf16.vlgmr.msra.gmra.mxu1 %vm146_vm4, %v2415_v59 }
 0x108   :  { %v991_v58 = vpop.f32.mrf.mxu0  ;;  %2046 = vmatprep.mubr.msk.bf16.mxu1 %vm146_vm4, %v2351_v41 }
 0x109   :  { %v894_v60 = vpack.c.bf16 %v893_v57, %v892_v56  ;;  %v992_v62 = vadd.f32 %v991_v58, %v2405_v45 }
 0x10a   :  { %v2054_v61 = vpop.f32.mrf.mxu0 }
 0x10b   :  { %2044 = vmatprep.subr.bf16.mxu1 %v894_v60  ;;  %v998_v2 = vmax.f32 %v992_v62, 0.0 }
 0x10c   :  { %2045 = vmatpush3.bf16.msra.mxu1 %v894_v60  ;;  %v994_v63 = vpop.f32.mrf.mxu0 }
 0x10d   :  { %v995_v0 = vadd.f32 %v994_v63, %v2408_v49 }
 0x10e   :  { %v2055_v1 = vpop.f32.mrf.mxu0 }
 0x10f   :  { %v999_v3 = vmax.f32 %v995_v0, 0.0  ;;  %2047 = vmatmul.mubr.msk.bf16.vlgmr.msra.gmra.mxu1 %vm146_vm4, %v2415_v59 }
 0x110   :  { %v1097_v4 = vpop.f32.mrf.mxu0  ;;  %2058 = vmatprep.mubr.msk.bf16.mxu1 %vm146_vm4, %v2351_v41 }
 0x111   :  { %v1000_v5 = vpack.c.bf16 %v999_v3, %v998_v2  ;;  %v1098_v7 = vadd.f32 %v1097_v4, %v2405_v45 }
 0x112   :  { %v2066_v6 = vpop.f32.mrf.mxu0 }
 0x113   :  { %2056 = vmatprep.subr.bf16.mxu1 %v1000_v5  ;;  %v1104_v11 = vmax.f32 %v1098_v7, 0.0 }
 0x114   :  { %2057 = vmatpush3.bf16.msra.mxu1 %v1000_v5  ;;  %v1100_v8 = vpop.f32.mrf.mxu0 }
 0x115   :  { %v1101_v9 = vadd.f32 %v1100_v8, %v2408_v49 }
 0x116   :  { %v2067_v10 = vpop.f32.mrf.mxu0 }
 0x117   :  { %v1105_v12 = vmax.f32 %v1101_v9, 0.0  ;;  %2059 = vmatmul.mubr.msk.bf16.vlgmr.msra.gmra.mxu1 %vm146_vm4, %v2415_v59  ;;  %v2512_v9 = vpop.permute.xlu0 %128 }
 0x118   :  { %v1203_v13 = vpop.f32.mrf.mxu0  ;;  %2070 = vmatprep.mubr.msk.bf16.mxu1 %vm146_vm4, %v2351_v41 }
 0x119   :  { %v1106_v14 = vpack.c.bf16 %v1105_v12, %v1104_v11  ;;  %v1204_v16 = vadd.f32 %v1203_v13, %v2405_v45 }
 0x11a   :  { %v2078_v15 = vpop.f32.mrf.mxu0 }
 0x11b   :  { %2068 = vmatprep.subr.bf16.mxu1 %v1106_v14  ;;  %v1210_v20 = vmax.f32 %v1204_v16, 0.0 }
 0x11c   :  { %2069 = vmatpush3.bf16.msra.mxu1 %v1106_v14  ;;  %v1206_v17 = vpop.f32.mrf.mxu0 }
 0x11d   :  { %v1207_v18 = vadd.f32 %v1206_v17, %v2408_v49 }
 0x11e   :  { %v2079_v19 = vpop.f32.mrf.mxu0 }
 0x11f   :  { %v1211_v21 = vmax.f32 %v1207_v18, 0.0  ;;  %2071 = vmatmul.mubr.msk.bf16.vlgmr.msra.gmra.mxu1 %vm146_vm4, %v2415_v59 }
 0x120   :  { %v1309_v22 = vpop.f32.mrf.mxu0  ;;  %2082 = vmatprep.mubr.msk.bf16.mxu1 %vm146_vm4, %v2351_v41 }
 0x121   :  { %v1212_v23 = vpack.c.bf16 %v1211_v21, %v1210_v20  ;;  %v1310_v25 = vadd.f32 %v1309_v22, %v2405_v45 }
 0x122   :  { %v2090_v24 = vpop.f32.mrf.mxu0 }
 0x123   :  { %2080 = vmatprep.subr.bf16.mxu1 %v1212_v23  ;;  %v1316_v29 = vmax.f32 %v1310_v25, 0.0 }
 0x124   :  { %2081 = vmatpush3.bf16.msra.mxu1 %v1212_v23  ;;  %v1312_v26 = vpop.f32.mrf.mxu0 }
 0x125   :  { %v1313_v27 = vadd.f32 %v1312_v26, %v2408_v49 }
 0x126   :  { %v2091_v28 = vpop.f32.mrf.mxu0 }
 0x127   :  { %v1317_v30 = vmax.f32 %v1313_v27, 0.0  ;;  %2083 = vmatmul.mubr.msk.bf16.vlgmr.msra.gmra.mxu1 %vm146_vm4, %v2415_v59 }
 0x128   :  { %v1415_v31 = vpop.f32.mrf.mxu0  ;;  %2094 = vmatprep.mubr.msk.bf16.mxu1 %vm146_vm4, %v2351_v41 }
 0x129   :  { %v1318_v32 = vpack.c.bf16 %v1317_v30, %v1316_v29  ;;  %v1416_v34 = vadd.f32 %v1415_v31, %v2405_v45 }
 0x12a   :  { %v2102_v33 = vpop.f32.mrf.mxu0 }
 0x12b   :  { %2092 = vmatprep.subr.bf16.mxu1 %v1318_v32  ;;  %v1422_v38 = vmax.f32 %v1416_v34, 0.0 }
 0x12c   :  { %2093 = vmatpush3.bf16.msra.mxu1 %v1318_v32  ;;  %v1418_v35 = vpop.f32.mrf.mxu0 }
 0x12d   :  { %v1419_v36 = vadd.f32 %v1418_v35, %v2408_v49 }
 0x12e   :  { %v2103_v37 = vpop.f32.mrf.mxu0 }
 0x12f   :  { %v1423_v39 = vmax.f32 %v1419_v36, 0.0  ;;  %2095 = vmatmul.mubr.msk.bf16.vlgmr.msra.gmra.mxu1 %vm146_vm4, %v2415_v59 }
 0x130   :  { %v1521_v40 = vpop.f32.mrf.mxu0  ;;  %2106 = vmatprep.mubr.msk.bf16.mxu1 %vm146_vm4, %v2351_v41 }
 0x131   :  { %v1424_v42 = vpack.c.bf16 %v1423_v39, %v1422_v38  ;;  %v1522_v44 = vadd.f32 %v1521_v40, %v2405_v45 }
 0x132   :  { %v2114_v43 = vpop.f32.mrf.mxu0 }
 0x133   :  { %2104 = vmatprep.subr.bf16.mxu1 %v1424_v42  ;;  %v1528_v50 = vmax.f32 %v1522_v44, 0.0 }
 0x134   :  { %2105 = vmatpush3.bf16.msra.mxu1 %v1424_v42  ;;  %v1524_v46 = vpop.f32.mrf.mxu0 }
 0x135   :  { %v1525_v47 = vadd.f32 %v1524_v46, %v2408_v49 }
 0x136   :  { %v2115_v48 = vpop.f32.mrf.mxu0 }
 0x137   :  { %v1529_v51 = vmax.f32 %v1525_v47, 0.0  ;;  %2107 = vmatmul.mubr.msk.bf16.vlgmr.msra.gmra.mxu1 %vm146_vm4, %v2415_v59 }
 0x138   :  { %v1627_v52 = vpop.f32.mrf.mxu0  ;;  %2118 = vmatprep.mubr.msk.bf16.mxu1 %vm146_vm4, %v2351_v41 }
 0x139   :  { %v1530_v53 = vpack.c.bf16 %v1529_v51, %v1528_v50  ;;  %v1628_v55 = vadd.f32 %v1627_v52, %v2405_v45 }
 0x13a   :  { %v2126_v54 = vpop.f32.mrf.mxu0 }
 0x13b   :  { %2116 = vmatprep.subr.bf16.mxu1 %v1530_v53  ;;  %v1634_v60 = vmax.f32 %v1628_v55, 0.0 }
 0x13c   :  { %2117 = vmatpush3.bf16.msra.mxu1 %v1530_v53  ;;  %v1630_v56 = vpop.f32.mrf.mxu0 }
 0x13d   :  { %v1631_v57 = vadd.f32 %v1630_v56, %v2408_v49 }
 0x13e   :  { %v2127_v58 = vpop.f32.mrf.mxu0 }
 0x13f   :  { %v1635_v61 = vmax.f32 %v1631_v57, 0.0  ;;  %2119 = vmatmul.mubr.msk.bf16.vlgmr.msra.gmra.mxu1 %vm146_vm4, %v2415_v59 }
 0x140   :  { %v1733_v62 = vpop.f32.mrf.mxu0  ;;  %2130 = vmatprep.mubr.msk.bf16.mxu1 %vm146_vm4, %v2351_v41 }
 0x141   :  { %v1636_v63 = vpack.c.bf16 %v1635_v61, %v1634_v60  ;;  %v1734_v1 = vadd.f32 %v1733_v62, %v2405_v45  ;;  %v2508_v45 = vpop.permute.xlu1 %118 }
 0x142   :  { %v2138_v0 = vpop.f32.mrf.mxu0 }
 0x143   :  { %2128 = vmatprep.subr.bf16.mxu1 %v1636_v63  ;;  %v1740_v5 = vmax.f32 %v1734_v1, 0.0 }
 0x144   :  { %2129 = vmatpush3.bf16.msra.mxu1 %v1636_v63  ;;  %v1736_v2 = vpop.f32.mrf.mxu0 }
 0x145   :  { %v1737_v3 = vadd.f32 %v1736_v2, %v2408_v49  ;;  %v2510_v8 = vpop.permute.xlu1 %123 }
 0x146   :  { %v2139_v4 = vpop.f32.mrf.mxu0 }
 0x147   :  { %v1741_v6 = vmax.f32 %v1737_v3, 0.0  ;;  %2131 = vmatmul.mubr.msk.bf16.vlgmr.msra.gmra.mxu1 %vm146_vm4, %v2415_v59 }
 0x148   :  { %2142 = vmatprep.mubr.msk.bf16.mxu1 %vm146_vm4, %v2351_v41 }
 0x149   :  { %v1742_v7 = vpack.c.bf16 %v1741_v6, %v1740_v5  ;;  %v2516_v41 = vpop.permute.xlu1 %133 }
 0x14b   :  { %2140 = vmatprep.subr.bf16.mxu1 %v1742_v7 }
 0x14c   :  { %2141 = vmatpush3.bf16.msra.mxu1 %v1742_v7 }
 0x14f   :  { %2143 = vmatmul.mubr.msk.bf16.vlgmr.msra.gmra.mxu1 %vm146_vm4, %v2415_v59 }
 0x197   :  { %v1964_v49 = vpop.f32.mrf.mxu1 }
 0x198   :  { %v196_v11 = vadd.f32 %v1964_v49, %v2512_v9 }
 0x199   :  { %v187_v10 = vpop.f32.mrf.mxu1 }
 0x19a   :  { %v188_v12 = vadd.f32 %v187_v10, %v2508_v45  ;;  %v204_v15 = vmax.f32 %v196_v11, 0.0 }
 0x19b   :  { %v1965_v13 = vpop.f32.mrf.mxu1 }
 0x19c   :  { %v199_v16 = vadd.f32 %v1965_v13, %v2516_v41  ;;  %v202_v59 = vmax.f32 %v188_v12, 0.0 }
 0x19d   :  { %v190_v14 = vpop.f32.mrf.mxu1 }
 0x19e   :  { %v191_v18 = vadd.f32 %v190_v14, %v2510_v8  ;;  %v205_v23 = vmax.f32 %v199_v16, 0.0 }
 0x19f   :  { %v1976_v17 = vpop.f32.mrf.mxu1 }
 0x1a0   :  { %v302_v19 = vadd.f32 %v1976_v17, %v2512_v9  ;;  %v203_v25 = vmax.f32 %v191_v18, 0.0 }
 0x1a1   :  { %v293_v20 = vpop.f32.mrf.mxu1 }
 0x1a2   :  { %v310_v21 = vmax.f32 %v302_v19, 0.0  ;;  %v294_v22 = vadd.f32 %v293_v20, %v2508_v45 }
 0x1a3   :  { %v1977_v24 = vpop.f32.mrf.mxu1 }
 0x1a4   :  { %v314_v26 = vmax.f32 %v204_v15, %v310_v21  ;;  %v308_v27 = vmax.f32 %v294_v22, 0.0  ;;  %v305_v28 = vadd.f32 %v1977_v24, %v2516_v41 }
 0x1a5   :  { %v296_v29 = vpop.f32.mrf.mxu1 }
 0x1a6   :  { %v312_v30 = vmax.f32 %v202_v59, %v308_v27  ;;  %v311_v31 = vmax.f32 %v305_v28, 0.0  ;;  %v297_v32 = vadd.f32 %v296_v29, %v2510_v8 }
 0x1a7   :  { %v1988_v33 = vpop.f32.mrf.mxu1 }
 0x1a8   :  { %v315_v34 = vmax.f32 %v205_v23, %v311_v31  ;;  %v309_v35 = vmax.f32 %v297_v32, 0.0  ;;  %v408_v36 = vadd.f32 %v1988_v33, %v2512_v9 }
 0x1a9   :  { %v399_v37 = vpop.f32.mrf.mxu1 }
 0x1aa   :  { %v313_v38 = vmax.f32 %v203_v25, %v309_v35  ;;  %v416_v39 = vmax.f32 %v408_v36, 0.0  ;;  %v400_v40 = vadd.f32 %v399_v37, %v2508_v45 }
 0x1ab   :  { %v1989_v42 = vpop.f32.mrf.mxu1 }
 0x1ac   :  { %v420_v43 = vmax.f32 %v314_v26, %v416_v39  ;;  %v414_v44 = vmax.f32 %v400_v40, 0.0  ;;  %v411_v46 = vadd.f32 %v1989_v42, %v2516_v41 }
 0x1ad   :  { %v402_v47 = vpop.f32.mrf.mxu1 }
 0x1ae   :  { %v418_v48 = vmax.f32 %v312_v30, %v414_v44  ;;  %v417_v50 = vmax.f32 %v411_v46, 0.0  ;;  %v403_v51 = vadd.f32 %v402_v47, %v2510_v8 }
 0x1af   :  { %v2000_v52 = vpop.f32.mrf.mxu1 }
 0x1b0   :  { %v421_v53 = vmax.f32 %v315_v34, %v417_v50  ;;  %v415_v54 = vmax.f32 %v403_v51, 0.0  ;;  %v514_v55 = vadd.f32 %v2000_v52, %v2512_v9 }
 0x1b1   :  { %v505_v56 = vpop.f32.mrf.mxu1 }
 0x1b2   :  { %v419_v57 = vmax.f32 %v313_v38, %v415_v54  ;;  %v522_v58 = vmax.f32 %v514_v55, 0.0  ;;  %v506_v60 = vadd.f32 %v505_v56, %v2508_v45 }
 0x1b3   :  { %v2001_v61 = vpop.f32.mrf.mxu1 }
 0x1b4   :  { %v526_v62 = vmax.f32 %v420_v43, %v522_v58  ;;  %v520_v63 = vmax.f32 %v506_v60, 0.0  ;;  %v517_v0 = vadd.f32 %v2001_v61, %v2516_v41 }
 0x1b5   :  { %v508_v1 = vpop.f32.mrf.mxu1 }
 0x1b6   :  { %v524_v2 = vmax.f32 %v418_v48, %v520_v63  ;;  %v523_v3 = vmax.f32 %v517_v0, 0.0  ;;  %v509_v4 = vadd.f32 %v508_v1, %v2510_v8 }
 0x1b7   :  { %v2012_v5 = vpop.f32.mrf.mxu1 }
 0x1b8   :  { %v527_v6 = vmax.f32 %v421_v53, %v523_v3  ;;  %v521_v7 = vmax.f32 %v509_v4, 0.0  ;;  %v620_v49 = vadd.f32 %v2012_v5, %v2512_v9 }
 0x1b9   :  { %v611_v10 = vpop.f32.mrf.mxu1 }
 0x1ba   :  { %v525_v11 = vmax.f32 %v419_v57, %v521_v7  ;;  %v628_v12 = vmax.f32 %v620_v49, 0.0  ;;  %v612_v13 = vadd.f32 %v611_v10, %v2508_v45 }
 0x1bb   :  { %v2013_v14 = vpop.f32.mrf.mxu1 }
 0x1bc   :  { %v632_v15 = vmax.f32 %v526_v62, %v628_v12  ;;  %v626_v16 = vmax.f32 %v612_v13, 0.0  ;;  %v623_v59 = vadd.f32 %v2013_v14, %v2516_v41 }
 0x1bd   :  { %v614_v17 = vpop.f32.mrf.mxu1 }
 0x1be   :  { %v630_v18 = vmax.f32 %v524_v2, %v626_v16  ;;  %v629_v19 = vmax.f32 %v623_v59, 0.0  ;;  %v615_v20 = vadd.f32 %v614_v17, %v2510_v8 }
 0x1bf   :  { %v2024_v21 = vpop.f32.mrf.mxu1 }
 0x1c0   :  { %v633_v22 = vmax.f32 %v527_v6, %v629_v19  ;;  %v627_v23 = vmax.f32 %v615_v20, 0.0  ;;  %v726_v52 = vadd.f32 %v2024_v21, %v2512_v9 }
 0x1c1   :  { %v717_v24 = vpop.f32.mrf.mxu1 }
 0x1c2   :  { %v631_v25 = vmax.f32 %v525_v11, %v627_v23  ;;  %v718_v54 = vadd.f32 %v717_v24, %v2508_v45  ;;  %v734_v60 = vmax.f32 %v726_v52, 0.0 }
 0x1c3   :  { %v2025_v26 = vpop.f32.mrf.mxu1 }
 0x1c4   :  { %v729_v55 = vadd.f32 %v2025_v26, %v2516_v41  ;;  %v732_v63 = vmax.f32 %v718_v54, 0.0  ;;  %v738_v49 = vmax.f32 %v632_v15, %v734_v60 }
 0x1c5   :  { %v720_v27 = vpop.f32.mrf.mxu1 }
 0x1c6   :  { %v721_v56 = vadd.f32 %v720_v27, %v2510_v8  ;;  %v735_v1 = vmax.f32 %v729_v55, 0.0  ;;  %v736_v12 = vmax.f32 %v630_v18, %v732_v63 }
 0x1c7   :  { %v2036_v28 = vpop.f32.mrf.mxu1 }
 0x1c8   :  { %v832_v57 = vadd.f32 %v2036_v28, %v2512_v9  ;;  %v733_v2 = vmax.f32 %v721_v56, 0.0  ;;  %v739_v59 = vmax.f32 %v633_v22, %v735_v1 }
 0x1c9   :  { %v823_v29 = vpop.f32.mrf.mxu1 }
 0x1ca   :  { %v824_v61 = vadd.f32 %v823_v29, %v2508_v45  ;;  %v840_v3 = vmax.f32 %v832_v57, 0.0  ;;  %v737_v17 = vmax.f32 %v631_v25, %v733_v2 }
 0x1cb   :  { %v2037_v30 = vpop.f32.mrf.mxu1 }
 0x1cc   :  { %v835_v0 = vadd.f32 %v2037_v30, %v2516_v41  ;;  %v838_v10 = vmax.f32 %v824_v61, 0.0  ;;  %v844_v19 = vmax.f32 %v738_v49, %v840_v3 }
 0x1cd   :  { %v826_v31 = vpop.f32.mrf.mxu1 }
 0x1ce   :  { %v827_v5 = vadd.f32 %v826_v31, %v2510_v8  ;;  %v841_v13 = vmax.f32 %v835_v0, 0.0  ;;  %v842_v15 = vmax.f32 %v736_v12, %v838_v10 }
 0x1cf   :  { %v2048_v32 = vpop.f32.mrf.mxu1 }
 0x1d0   :  { %v938_v6 = vadd.f32 %v2048_v32, %v2512_v9  ;;  %v839_v23 = vmax.f32 %v827_v5, 0.0  ;;  %v845_v31 = vmax.f32 %v739_v59, %v841_v13 }
 0x1d1   :  { %v929_v33 = vpop.f32.mrf.mxu1 }
 0x1d2   :  { %v930_v7 = vadd.f32 %v929_v33, %v2508_v45  ;;  %v946_v24 = vmax.f32 %v938_v6, 0.0  ;;  %v843_v52 = vmax.f32 %v737_v17, %v839_v23 }
 0x1d3   :  { %v2049_v34 = vpop.f32.mrf.mxu1 }
 0x1d4   :  { %v941_v14 = vadd.f32 %v2049_v34, %v2516_v41  ;;  %v944_v26 = vmax.f32 %v930_v7, 0.0 }
 0x1d5   :  { %v932_v35 = vpop.f32.mrf.mxu1 }
 0x1d6   :  { %v933_v16 = vadd.f32 %v932_v35, %v2510_v8  ;;  %v947_v22 = vmax.f32 %v941_v14, 0.0  ;;  %v948_v54 = vmax.f32 %v842_v15, %v944_v26 }
 0x1d7   :  { %v2060_v36 = vpop.f32.mrf.mxu1 }
 0x1d8   :  { %v1044_v20 = vadd.f32 %v2060_v36, %v2512_v9  ;;  %v945_v25 = vmax.f32 %v933_v16, 0.0  ;;  %v951_v61 = vmax.f32 %v845_v31, %v947_v22 }
 0x1d9   :  { %v1035_v37 = vpop.f32.mrf.mxu1 }
 0x1da   :  { %v1036_v27 = vadd.f32 %v1035_v37, %v2508_v45  ;;  %v1052_v33 = vmax.f32 %v1044_v20, 0.0 }
 0x1db   :  { %v2061_v38 = vpop.f32.mrf.mxu1 }
 0x1dc   :  { %v1047_v28 = vadd.f32 %v2061_v38, %v2516_v41  ;;  %v950_v38 = vmax.f32 %v844_v19, %v946_v24 }
 0x1dd   :  { %v1038_v39 = vpop.f32.mrf.mxu1 }
 0x1de   :  { %v1039_v18 = vadd.f32 %v1038_v39, %v2510_v8  ;;  %v1050_v39 = vmax.f32 %v1036_v27, 0.0  ;;  %v1053_v55 = vmax.f32 %v1047_v28, 0.0 }
 0x1df   :  { %v2072_v40 = vpop.f32.mrf.mxu1 }
 0x1e0   :  { %v1150_v29 = vadd.f32 %v2072_v40, %v2512_v9  ;;  %v1051_v40 = vmax.f32 %v1039_v18, 0.0  ;;  %v1054_v3 = vmax.f32 %v948_v54, %v1050_v39  ;;  %v1057_v7 = vmax.f32 %v951_v61, %v1053_v55 }
 0x1e1   :  { %v1141_v42 = vpop.f32.mrf.mxu1 }
 0x1e2   :  { %v1142_v32 = vadd.f32 %v1141_v42, %v2508_v45  ;;  %v1158_v56 = vmax.f32 %v1150_v29, 0.0  ;;  %v949_v42 = vmax.f32 %v843_v52, %v945_v25 }
 0x1e3   :  { %v2073_v43 = vpop.f32.mrf.mxu1 }
 0x1e4   :  { %v1153_v34 = vadd.f32 %v2073_v43, %v2516_v41  ;;  %v1156_v63 = vmax.f32 %v1142_v32, 0.0  ;;  %v1055_v49 = vmax.f32 %v949_v42, %v1051_v40 }
 0x1e5   :  { %v1144_v44 = vpop.f32.mrf.mxu1 }
 0x1e6   :  { %v1145_v35 = vadd.f32 %v1144_v44, %v2510_v8  ;;  %v1056_v44 = vmax.f32 %v950_v38, %v1052_v33  ;;  %v1159_v0 = vmax.f32 %v1153_v34, 0.0  ;;  %v1160_v13 = vmax.f32 %v1054_v3, %v1156_v63 }
 0x1e7   :  { %v2084_v46 = vpop.f32.mrf.mxu1 }
 0x1e8   :  { %v1256_v36 = vadd.f32 %v2084_v46, %v2512_v9  ;;  %v1157_v46 = vmax.f32 %v1145_v35, 0.0  ;;  %v1162_v10 = vmax.f32 %v1056_v44, %v1158_v56 }
 0x1e9   :  { %v1247_v47 = vpop.f32.mrf.mxu1 }
 0x1ea   :  { %v1248_v57 = vadd.f32 %v1247_v47, %v2508_v45  ;;  %v1264_v1 = vmax.f32 %v1256_v36, 0.0  ;;  %v1161_v17 = vmax.f32 %v1055_v49, %v1157_v46 }
 0x1eb   :  { %v2536_v48 = vpop.f32.mrf.mxu1 }
 0x1ec   :  { %v1259_v43 = vadd.f32 %v2536_v48, %v2516_v41  ;;  %v1262_v12 = vmax.f32 %v1248_v57, 0.0  ;;  %v1268_v19 = vmax.f32 %v1162_v10, %v1264_v1 }
 0x1ed   :  { %v2538_v50 = vpop.f32.mrf.mxu1 }
 0x1ee   :  { %v1251_v5 = vadd.f32 %v2538_v50, %v2510_v8  ;;  %v1265_v14 = vmax.f32 %v1259_v43, 0.0  ;;  %v1163_v50 = vmax.f32 %v1057_v7, %v1159_v0  ;;  %v1266_v27 = vmax.f32 %v1160_v13, %v1262_v12 }
 0x1ef   :  { %v2540_v51 = vpop.f32.mrf.mxu1 }
 0x1f0   :  { %v1362_v6 = vadd.f32 %v2540_v51, %v2512_v9  ;;  %v1269_v18 = vmax.f32 %v1163_v50, %v1265_v14 }
 0x1f1   :  { %v2543_v53 = vpop.f32.mrf.mxu1 }
 0x1f2   :  { %v1354_v47 = vadd.f32 %v2543_v53, %v2508_v45  ;;  %v1263_v53 = vmax.f32 %v1251_v5, 0.0  ;;  %v1370_v23 = vmax.f32 %v1362_v6, 0.0 }
 0x1f3   :  { %v2549_v58 = vpop.f32.mrf.mxu1 }
 0x1f4   :  { %v1365_v16 = vadd.f32 %v2549_v58, %v2516_v41  ;;  %v1368_v24 = vmax.f32 %v1354_v47, 0.0  ;;  %v1267_v35 = vmax.f32 %v1161_v17, %v1263_v53 }
 0x1f5   :  { %v2552_v62 = vpop.f32.mrf.mxu1 }
 0x1f6   :  { %v1357_v15 = vadd.f32 %v2552_v62, %v2510_v8  ;;  %v1371_v29 = vmax.f32 %v1365_v16, 0.0  ;;  %v1374_v62 = vmax.f32 %v1268_v19, %v1370_v23  ;;  %v1372_v36 = vmax.f32 %v1266_v27, %v1368_v24 }
 0x1f7   :  { %v2555_v4 = vpop.f32.mrf.mxu1 }
 0x1f8   :  { %v1468_v59 = vadd.f32 %v2555_v4, %v2512_v9  ;;  %v1375_v55 = vmax.f32 %v1269_v18, %v1371_v29 }
 0x1f9   :  { %v1459_v11 = vpop.f32.mrf.mxu1 }
 0x1fa   :  { %v1460_v51 = vadd.f32 %v1459_v11, %v2508_v45  ;;  %v1476_v31 = vmax.f32 %v1468_v59, 0.0 }
 0x1fb   :  { %v2109_v21 = vpop.f32.mrf.mxu1 }
 0x1fc   :  { %v1471_v58 = vadd.f32 %v2109_v21, %v2516_v41  ;;  %v1474_v22 = vmax.f32 %v1460_v51, 0.0  ;;  %v1480_v40 = vmax.f32 %v1374_v62, %v1476_v31 }
 0x1fd   :  { %v1462_v30 = vpop.f32.mrf.mxu1 }
 0x1fe   :  { %v1463_v25 = vadd.f32 %v1462_v30, %v2510_v8  ;;  %v1477_v52 = vmax.f32 %v1471_v58, 0.0  ;;  %v1478_v57 = vmax.f32 %v1372_v36, %v1474_v22 }
 0x1ff   :  { %v2120_v37 = vpop.f32.mrf.mxu1 }
 0x200   :  { %v1574_v26 = vadd.f32 %v2120_v37, %v2512_v9  ;;  %v1369_v37 = vmax.f32 %v1357_v15, 0.0  ;;  %v1481_v1 = vmax.f32 %v1375_v55, %v1477_v52 }
 0x201   :  { %v1565_v60 = vpop.f32.mrf.mxu1 }
 0x202   :  { %v1566_v28 = vadd.f32 %v1565_v60, %v2508_v45  ;;  %v1582_v21 = vmax.f32 %v1574_v26, 0.0  ;;  %v1475_v60 = vmax.f32 %v1463_v25, 0.0  ;;  %v1373_v46 = vmax.f32 %v1267_v35, %v1369_v37 }
 0x203   :  { %v2121_v2 = vpop.f32.mrf.mxu1 }
 0x204   :  { %v1577_v32 = vadd.f32 %v2121_v2, %v2516_v41  ;;  %v1580_v38 = vmax.f32 %v1566_v28, 0.0  ;;  %v1586_v43 = vmax.f32 %v1480_v40, %v1582_v21  ;;  %v1479_v10 = vmax.f32 %v1373_v46, %v1475_v60 }
 0x205   :  { %v1568_v48 = vpop.f32.mrf.mxu1 }
 0x206   :  { %v1569_v54 = vadd.f32 %v1568_v48, %v2510_v8  ;;  %v1583_v61 = vmax.f32 %v1577_v32, 0.0  ;;  %v1584_v2 = vmax.f32 %v1478_v57, %v1580_v38 }
 0x207   :  { %v2132_v20 = vpop.f32.mrf.mxu1 }
 0x208   :  { %v1680_v11 = vadd.f32 %v2132_v20, %v2512_v9  ;;  %v1581_v3 = vmax.f32 %v1569_v54, 0.0  ;;  %v1587_v12 = vmax.f32 %v1481_v1, %v1583_v61 }
 0x209   :  { %v1671_v4 = vpop.f32.mrf.mxu1 }
 0x20a   :  { %v1672_v33 = vadd.f32 %v1671_v4, %v2508_v45  ;;  %v1688_v56 = vmax.f32 %v1680_v11, 0.0 }
 0x20b   :  { %v2133_v34 = vpop.f32.mrf.mxu1 }
 0x20c   :  { %v1683_v30 = vadd.f32 %v2133_v34, %v2516_v41  ;;  %v1686_v42 = vmax.f32 %v1672_v33, 0.0  ;;  %v1692_v6 = vmax.f32 %v1586_v43, %v1688_v56 }
 0x20d   :  { %v1674_v39 = vpop.f32.mrf.mxu1 }
 0x20e   :  { %v1675_v44 = vadd.f32 %v1674_v39, %v2510_v8  ;;  %v1689_v47 = vmax.f32 %v1683_v30, 0.0  ;;  %v1690_v48 = vmax.f32 %v1584_v2, %v1686_v42 }
 0x20f   :  { %v2144_v63 = vpop.f32.mrf.mxu1 }
 0x210   :  { %v1786_v0 = vadd.f32 %v2144_v63, %v2512_v9  ;;  %v1687_v14 = vmax.f32 %v1675_v44, 0.0  ;;  %v1585_v9 = vmax.f32 %v1479_v10, %v1581_v3  ;;  %v1693_v19 = vmax.f32 %v1587_v12, %v1689_v47 }
 0x211   :  { %v1777_v5 = vpop.f32.mrf.mxu1 }
 0x212   :  { %v1794_v7 = vmax.f32 %v1786_v0, 0.0  ;;  %v1778_v49 = vadd.f32 %v1777_v5, %v2508_v45  ;;  %v1691_v53 = vmax.f32 %v1585_v9, %v1687_v14 }
 0x213   :  { %v2145_v13 = vpop.f32.mrf.mxu1 }
 0x214   :  { %v1798_v16 = vmax.f32 %v1692_v6, %v1794_v7  ;;  %v1792_v59 = vmax.f32 %v1778_v49, 0.0  ;;  %v1789_v50 = vadd.f32 %v2145_v13, %v2516_v41 }
 0x215   :  { %v1780_v17 = vpop.f32.mrf.mxu1 }
 0x216   :  { %1802 = vst [vmem:[%s2618_s5 + $0x10] sm:$0xff] %v1798_v16  ;;  %v1796_v51 = vmax.f32 %v1690_v48, %v1792_v59  ;;  %v1795_v20 = vmax.f32 %v1789_v50, 0.0  ;;  %v1781_v45 = vadd.f32 %v1780_v17, %v2510_v8 }
 0x218   :  { %1800 = vst [vmem:[%s2618_s5] sm:$0xff] %v1796_v51  ;;  %v1799_v23 = vmax.f32 %v1693_v19, %v1795_v20  ;;  %v1793_v24 = vmax.f32 %v1781_v45, 0.0 }
 0x21a   :  { %1803 = vst [vmem:[%s2618_s5 + $0x18] sm:$0xff] %v1799_v23  ;;  %v1797_v41 = vmax.f32 %v1691_v53, %v1793_v24 }
 0x21c   :  { %1801 = vst [vmem:[%s2618_s5 + $0x8] sm:$0xff] %v1797_v41 }

</bundles_post_ra>
